<compile_context>
chip_gen: v5e
topology: v5e:2x2
jax: 0.10.0
libtpu: 0.0.40
codegen_flags: <defaults>
</compile_context>

<pallas_src>
import math

import jax
import jax.numpy as jnp
from jax.experimental import pallas as pl
from jax.experimental.pallas import tpu as pltpu

BN_EPS = 1e-5        # nn.BatchNorm1d default eps
VAR_EPS = 1e-4       # VICRegLoss eps
SIM_COEFF = 25.0
STD_COEFF = 25.0
COV_COEFF = 1.0


# ----------------------------------------------------------------------------- #
# Kernel
# ----------------------------------------------------------------------------- #
def _projector_block(x, w1, w2, b1, gamma, beta, b2):
    """Linear -> BatchNorm1d (training-mode batch stats) -> ReLU -> Linear.

    Matmuls use bf16 operands on the MXU with f32 accumulation; BN / ReLU
    math stays in f32.  BN affine is folded into one scale/shift.
    """
    h = jnp.dot(x.astype(jnp.bfloat16), w1,
                preferred_element_type=jnp.float32) + b1          # [B, H] f32
    mean = jnp.mean(h, axis=0, keepdims=True)
    var = jnp.mean((h - mean) * (h - mean), axis=0, keepdims=True)  # biased
    scale = gamma * jax.lax.rsqrt(var + BN_EPS)
    shift = beta - mean * scale
    h = jnp.maximum(h * scale + shift, 0.0)
    return jnp.dot(h.astype(jnp.bfloat16), w2,
                   preferred_element_type=jnp.float32) + b2       # [B, D] f32


def vicreg_kernel(z1_ref, z2_ref, w1_ref, w2_ref, vec_ref, o_ref):
    # Packed per-projector vectors: rows 0..3 -> proj1 (b1, gamma, beta, b2),
    # rows 4..7 -> proj2.
    vecs = vec_ref[...]                                           # [8, 128] f32
    d = vecs.shape[1]

    # Lane-aligned halves of the pre-concatenated weights.
    w1a = w1_ref[:, 0:d]
    w1b = w1_ref[:, d:2 * d]
    w2a = w2_ref[:, 0:d]
    w2b = w2_ref[:, d:2 * d]

    # ---- both projectors, fully in VMEM / vregs ----
    z1 = _projector_block(z1_ref[...], w1a, w2a,
                          vecs[0:1], vecs[1:2], vecs[2:3], vecs[3:4])
    z2 = _projector_block(z2_ref[...], w1b, w2b,
                          vecs[4:5], vecs[5:6], vecs[6:7], vecs[7:8])

    b = z1.shape[0]
    bm1 = b - 1

    # ---- invariance term: F.mse_loss(z1, z2) ----
    diff = z1 - z2
    sim_loss = jnp.sum(diff * diff) / (b * d)

    # ---- variance term (torch .var(dim=0) is unbiased) ----
    mean1 = jnp.mean(z1, axis=0, keepdims=True)
    mean2 = jnp.mean(z2, axis=0, keepdims=True)
    zc1 = z1 - mean1
    zc2 = z2 - mean2
    colsq1 = jnp.sum(zc1 * zc1, axis=0, keepdims=True)   # = diag(cov1) * (B-1)
    colsq2 = jnp.sum(zc2 * zc2, axis=0, keepdims=True)   # = diag(cov2) * (B-1)
    std1 = jnp.sqrt(colsq1 / bm1 + VAR_EPS)
    std2 = jnp.sqrt(colsq2 / bm1 + VAR_EPS)
    std_loss = (jnp.mean(jnp.maximum(1.0 - std1, 0.0))
                + jnp.mean(jnp.maximum(1.0 - std2, 0.0)))

    # ---- covariance term via sum(cov^2) - sum(diag^2) identity ----
    # Unscaled cov (zc^T @ zc); the /(B-1) is folded into the final divisor.
    dimnums = (((0,), (0,)), ((), ()))
    cov1u = jax.lax.dot_general(zc1, zc1, dimnums,
                                precision=jax.lax.Precision.HIGHEST,
                                preferred_element_type=jnp.float32)
    cov2u = jax.lax.dot_general(zc2, zc2, dimnums,
                                precision=jax.lax.Precision.HIGHEST,
                                preferred_element_type=jnp.float32)
    cov_loss = ((jnp.sum(cov1u * cov1u) - jnp.sum(colsq1 * colsq1)
                 + jnp.sum(cov2u * cov2u) - jnp.sum(colsq2 * colsq2))
                / (bm1 * bm1 * d))

    o_ref[0] = SIM_COEFF * sim_loss + STD_COEFF * std_loss + COV_COEFF * cov_loss


# ----------------------------------------------------------------------------- #
# Wrapper
# ----------------------------------------------------------------------------- #
def vicreg_forward(z1, z2, packed):
    """Full VICRegLoss.forward in a single fused Pallas kernel launch."""
    batch, in_dim = z1.shape
    d = packed["vecs"].shape[1]          # hidden == out == 128

    operands = (z1, z2, packed["w1"], packed["w2"], packed["vecs"])

    flops = int(2 * 2 * batch * (in_dim * d + d * d)      # two projectors
                + 2 * 2 * batch * d * d)                  # two cov matmuls
    transcendentals = int(4 * d)                          # rsqrt + sqrt per branch
    bytes_accessed = int(sum(int(x.size) * x.dtype.itemsize for x in operands) + 4)

    vmem_spec = pl.BlockSpec(memory_space=pltpu.MemorySpace.VMEM)

    out = pl.pallas_call(
        vicreg_kernel,
        out_shape=jax.ShapeDtypeStruct((1,), jnp.float32),
        in_specs=[vmem_spec] * len(operands),
        out_specs=pl.BlockSpec(memory_space=pltpu.MemorySpace.SMEM),
        cost_estimate=pl.CostEstimate(flops=flops,
                                      transcendentals=transcendentals,
                                      bytes_accessed=bytes_accessed),
    )(*operands)
    return out[0]


# ----------------------------------------------------------------------------- #
# Deterministic parameter init (mimics PyTorch Linear default uniform init;
# BatchNorm gamma=1, beta=0).  Weights pre-transposed to [in, out] and stored
# in bf16; tiny vectors packed into one [8, 128] f32 operand.
# ----------------------------------------------------------------------------- #
def _init_projector_raw(key, in_dim=1024, hidden_dim=128, out_dim=128):
    k1, k2, k3, k4 = jax.random.split(key, 4)
    bound1 = 1.0 / math.sqrt(in_dim)
    bound2 = 1.0 / math.sqrt(hidden_dim)
    return {
        "w1": jax.random.uniform(k1, (in_dim, hidden_dim), jnp.float32,
                                 -bound1, bound1).astype(jnp.bfloat16),
        "b1": jax.random.uniform(k2, (hidden_dim,), jnp.float32, -bound1, bound1),
        "gamma": jnp.ones((hidden_dim,), jnp.float32),
        "beta": jnp.zeros((hidden_dim,), jnp.float32),
        "w2": jax.random.uniform(k3, (hidden_dim, out_dim), jnp.float32,
                                 -bound2, bound2).astype(jnp.bfloat16),
        "b2": jax.random.uniform(k4, (out_dim,), jnp.float32, -bound2, bound2),
    }


def init_vicreg_params(key):
    k1, k2 = jax.random.split(key, 2)
    # VICRegLoss uses Projector(1024, 128): in=1024, hidden=128, out=128 (default)
    p1 = _init_projector_raw(k1, 1024, 128, 128)
    p2 = _init_projector_raw(k2, 1024, 128, 128)
    packed = {
        "w1": jnp.concatenate([p1["w1"], p2["w1"]], axis=1),     # [1024, 256] bf16
        "w2": jnp.concatenate([p1["w2"], p2["w2"]], axis=1),     # [128,  256] bf16
        "vecs": jnp.stack([p1["b1"], p1["gamma"], p1["beta"], p1["b2"],
                           p2["b1"], p2["gamma"], p2["beta"], p2["b2"]],
                          axis=0),                                # [8, 128] f32
    }
    return packed


# ----------------------------------------------------------------------------- #
# Main
# ----------------------------------------------------------------------------- #
if __name__ == "__main__":
    key = jax.random.PRNGKey(0)
    kp, kz1, kz2 = jax.random.split(key, 3)

    packed = init_vicreg_params(kp)

    batch = 8  # small batch; feature dim fixed by the module (in_dim=1024)
    z1 = jax.random.normal(kz1, (batch, 1024), jnp.float32)
    z2 = jax.random.normal(kz2, (batch, 1024), jnp.float32)

    loss = vicreg_forward(z1, z2, packed)
    jax.block_until_ready(loss)

    assert loss.shape == () and bool(jnp.isfinite(loss))
    print("KERNEL_OK")
</pallas_src>

<mosaic_0001>
module attributes {stable_mosaic.version = 11 : i64} {
  func.func @vicreg_kernel(%arg0: memref<8x1024xf32, #tpu.memory_space<vmem>>, %arg1: memref<8x1024xf32, #tpu.memory_space<vmem>>, %arg2: memref<1024x256xbf16, #tpu.memory_space<vmem>>, %arg3: memref<128x256xbf16, #tpu.memory_space<vmem>>, %arg4: memref<8x128xf32, #tpu.memory_space<vmem>>, %arg5: memref<1xf32, #tpu.memory_space<smem>>) attributes {dimension_semantics = [], scalar_prefetch = 0 : i64, scratch_operands = 0 : i64, tpu.core_type = #tpu.core_type<tc>} {
    %c0 = arith.constant 0 : index
    %c0_0 = arith.constant 0 : index
    %0 = vector.load %arg4[%c0, %c0_0] : memref<8x128xf32, #tpu.memory_space<vmem>>, vector<8x128xf32>
    %c0_1 = arith.constant 0 : index
    %c0_2 = arith.constant 0 : index
    %1 = vector.load %arg2[%c0_1, %c0_2] : memref<1024x256xbf16, #tpu.memory_space<vmem>>, vector<1024x128xbf16>
    %c0_3 = arith.constant 0 : index
    %c128 = arith.constant 128 : index
    %2 = vector.load %arg2[%c0_3, %c128] : memref<1024x256xbf16, #tpu.memory_space<vmem>>, vector<1024x128xbf16>
    %c0_4 = arith.constant 0 : index
    %c0_5 = arith.constant 0 : index
    %3 = vector.load %arg3[%c0_4, %c0_5] : memref<128x256xbf16, #tpu.memory_space<vmem>>, vector<128x128xbf16>
    %c0_6 = arith.constant 0 : index
    %c128_7 = arith.constant 128 : index
    %4 = vector.load %arg3[%c0_6, %c128_7] : memref<128x256xbf16, #tpu.memory_space<vmem>>, vector<128x128xbf16>
    %c0_8 = arith.constant 0 : index
    %c0_9 = arith.constant 0 : index
    %5 = vector.load %arg0[%c0_8, %c0_9] : memref<8x1024xf32, #tpu.memory_space<vmem>>, vector<8x1024xf32>
    %6 = vector.extract_strided_slice %0 {offsets = [0, 0], sizes = [1, 128], strides = [1, 1]} : vector<8x128xf32> to vector<1x128xf32>
    %7 = vector.extract_strided_slice %0 {offsets = [1, 0], sizes = [1, 128], strides = [1, 1]} : vector<8x128xf32> to vector<1x128xf32>
    %8 = vector.extract_strided_slice %0 {offsets = [2, 0], sizes = [1, 128], strides = [1, 1]} : vector<8x128xf32> to vector<1x128xf32>
    %9 = vector.extract_strided_slice %0 {offsets = [3, 0], sizes = [1, 128], strides = [1, 1]} : vector<8x128xf32> to vector<1x128xf32>
    %10 = arith.truncf %5 : vector<8x1024xf32> to vector<8x1024xbf16>
    %cst = arith.constant dense<0.000000e+00> : vector<8x128xf32>
    %11 = tpu.matmul %10, %1, %cst {dimension_numbers = #tpu.dot_dimension_numbers<[1], [0], [0], [1], [0, 0, 1, 1], [], []>} : vector<8x1024xbf16>, vector<1024x128xbf16>, vector<8x128xf32> -> vector<8x128xf32>
    %12 = vector.broadcast %6 : vector<1x128xf32> to vector<8x128xf32>
    %13 = arith.addf %11, %12 : vector<8x128xf32>
    %cst_10 = arith.constant dense<0.000000e+00> : vector<128xf32>
    %14 = vector.multi_reduction <add>, %13, %cst_10 [0] : vector<8x128xf32> to vector<128xf32>
    %15 = vector.shape_cast %14 : vector<128xf32> to vector<1x128xf32>
    %cst_11 = arith.constant 8.000000e+00 : f32
    %16 = vector.broadcast %cst_11 : f32 to vector<1x128xf32>
    %17 = arith.divf %15, %16 : vector<1x128xf32>
    %18 = vector.broadcast %17 : vector<1x128xf32> to vector<8x128xf32>
    %19 = arith.subf %13, %18 : vector<8x128xf32>
    %20 = vector.broadcast %17 : vector<1x128xf32> to vector<8x128xf32>
    %21 = arith.subf %13, %20 : vector<8x128xf32>
    %22 = arith.mulf %19, %21 : vector<8x128xf32>
    %cst_12 = arith.constant dense<0.000000e+00> : vector<128xf32>
    %23 = vector.multi_reduction <add>, %22, %cst_12 [0] : vector<8x128xf32> to vector<128xf32>
    %24 = vector.shape_cast %23 : vector<128xf32> to vector<1x128xf32>
    %cst_13 = arith.constant 8.000000e+00 : f32
    %25 = vector.broadcast %cst_13 : f32 to vector<1x128xf32>
    %26 = arith.divf %24, %25 : vector<1x128xf32>
    %cst_14 = arith.constant 9.99999974E-6 : f32
    %27 = vector.broadcast %cst_14 : f32 to vector<1x128xf32>
    %28 = arith.addf %26, %27 : vector<1x128xf32>
    %29 = math.rsqrt %28 : vector<1x128xf32>
    %30 = arith.mulf %7, %29 : vector<1x128xf32>
    %31 = arith.mulf %17, %30 : vector<1x128xf32>
    %32 = arith.subf %8, %31 : vector<1x128xf32>
    %33 = vector.broadcast %30 : vector<1x128xf32> to vector<8x128xf32>
    %34 = arith.mulf %13, %33 : vector<8x128xf32>
    %35 = vector.broadcast %32 : vector<1x128xf32> to vector<8x128xf32>
    %36 = arith.addf %34, %35 : vector<8x128xf32>
    %cst_15 = arith.constant 0.000000e+00 : f32
    %37 = vector.broadcast %cst_15 : f32 to vector<8x128xf32>
    %38 = arith.maximumf %36, %37 : vector<8x128xf32>
    %39 = arith.truncf %38 : vector<8x128xf32> to vector<8x128xbf16>
    %cst_16 = arith.constant dense<0.000000e+00> : vector<8x128xf32>
    %40 = tpu.matmul %39, %3, %cst_16 {dimension_numbers = #tpu.dot_dimension_numbers<[1], [0], [0], [1], [0, 0, 1, 1], [], []>} : vector<8x128xbf16>, vector<128x128xbf16>, vector<8x128xf32> -> vector<8x128xf32>
    %41 = vector.broadcast %9 : vector<1x128xf32> to vector<8x128xf32>
    %42 = arith.addf %40, %41 : vector<8x128xf32>
    %c0_17 = arith.constant 0 : index
    %c0_18 = arith.constant 0 : index
    %43 = vector.load %arg1[%c0_17, %c0_18] : memref<8x1024xf32, #tpu.memory_space<vmem>>, vector<8x1024xf32>
    %44 = vector.extract_strided_slice %0 {offsets = [4, 0], sizes = [1, 128], strides = [1, 1]} : vector<8x128xf32> to vector<1x128xf32>
    %45 = vector.extract_strided_slice %0 {offsets = [5, 0], sizes = [1, 128], strides = [1, 1]} : vector<8x128xf32> to vector<1x128xf32>
    %46 = vector.extract_strided_slice %0 {offsets = [6, 0], sizes = [1, 128], strides = [1, 1]} : vector<8x128xf32> to vector<1x128xf32>
    %47 = vector.extract_strided_slice %0 {offsets = [7, 0], sizes = [1, 128], strides = [1, 1]} : vector<8x128xf32> to vector<1x128xf32>
    %48 = arith.truncf %43 : vector<8x1024xf32> to vector<8x1024xbf16>
    %cst_19 = arith.constant dense<0.000000e+00> : vector<8x128xf32>
    %49 = tpu.matmul %48, %2, %cst_19 {dimension_numbers = #tpu.dot_dimension_numbers<[1], [0], [0], [1], [0, 0, 1, 1], [], []>} : vector<8x1024xbf16>, vector<1024x128xbf16>, vector<8x128xf32> -> vector<8x128xf32>
    %50 = vector.broadcast %44 : vector<1x128xf32> to vector<8x128xf32>
    %51 = arith.addf %49, %50 : vector<8x128xf32>
    %cst_20 = arith.constant dense<0.000000e+00> : vector<128xf32>
    %52 = vector.multi_reduction <add>, %51, %cst_20 [0] : vector<8x128xf32> to vector<128xf32>
    %53 = vector.shape_cast %52 : vector<128xf32> to vector<1x128xf32>
    %cst_21 = arith.constant 8.000000e+00 : f32
    %54 = vector.broadcast %cst_21 : f32 to vector<1x128xf32>
    %55 = arith.divf %53, %54 : vector<1x128xf32>
    %56 = vector.broadcast %55 : vector<1x128xf32> to vector<8x128xf32>
    %57 = arith.subf %51, %56 : vector<8x128xf32>
    %58 = vector.broadcast %55 : vector<1x128xf32> to vector<8x128xf32>
    %59 = arith.subf %51, %58 : vector<8x128xf32>
    %60 = arith.mulf %57, %59 : vector<8x128xf32>
    %cst_22 = arith.constant dense<0.000000e+00> : vector<128xf32>
    %61 = vector.multi_reduction <add>, %60, %cst_22 [0] : vector<8x128xf32> to vector<128xf32>
    %62 = vector.shape_cast %61 : vector<128xf32> to vector<1x128xf32>
    %cst_23 = arith.constant 8.000000e+00 : f32
    %63 = vector.broadcast %cst_23 : f32 to vector<1x128xf32>
    %64 = arith.divf %62, %63 : vector<1x128xf32>
    %cst_24 = arith.constant 9.99999974E-6 : f32
    %65 = vector.broadcast %cst_24 : f32 to vector<1x128xf32>
    %66 = arith.addf %64, %65 : vector<1x128xf32>
    %67 = math.rsqrt %66 : vector<1x128xf32>
    %68 = arith.mulf %45, %67 : vector<1x128xf32>
    %69 = arith.mulf %55, %68 : vector<1x128xf32>
    %70 = arith.subf %46, %69 : vector<1x128xf32>
    %71 = vector.broadcast %68 : vector<1x128xf32> to vector<8x128xf32>
    %72 = arith.mulf %51, %71 : vector<8x128xf32>
    %73 = vector.broadcast %70 : vector<1x128xf32> to vector<8x128xf32>
    %74 = arith.addf %72, %73 : vector<8x128xf32>
    %cst_25 = arith.constant 0.000000e+00 : f32
    %75 = vector.broadcast %cst_25 : f32 to vector<8x128xf32>
    %76 = arith.maximumf %74, %75 : vector<8x128xf32>
    %77 = arith.truncf %76 : vector<8x128xf32> to vector<8x128xbf16>
    %cst_26 = arith.constant dense<0.000000e+00> : vector<8x128xf32>
    %78 = tpu.matmul %77, %4, %cst_26 {dimension_numbers = #tpu.dot_dimension_numbers<[1], [0], [0], [1], [0, 0, 1, 1], [], []>} : vector<8x128xbf16>, vector<128x128xbf16>, vector<8x128xf32> -> vector<8x128xf32>
    %79 = vector.broadcast %47 : vector<1x128xf32> to vector<8x128xf32>
    %80 = arith.addf %78, %79 : vector<8x128xf32>
    %81 = arith.subf %42, %80 : vector<8x128xf32>
    %82 = arith.mulf %81, %81 : vector<8x128xf32>
    %83 = vector.shape_cast %82 : vector<8x128xf32> to vector<1x8x128xf32>
    %cst_27 = arith.constant dense<0.000000e+00> : vector<1xf32>
    %84 = vector.multi_reduction <add>, %83, %cst_27 [1, 2] : vector<1x8x128xf32> to vector<1xf32>
    %85 = vector.shape_cast %84 : vector<1xf32> to vector<1x1x1xf32>
    %86 = vector.extract %85[0, 0, 0] : f32 from vector<1x1x1xf32>
    %cst_28 = arith.constant 1.024000e+03 : f32
    %87 = arith.divf %86, %cst_28 : f32
    %cst_29 = arith.constant dense<0.000000e+00> : vector<128xf32>
    %88 = vector.multi_reduction <add>, %42, %cst_29 [0] : vector<8x128xf32> to vector<128xf32>
    %89 = vector.shape_cast %88 : vector<128xf32> to vector<1x128xf32>
    %cst_30 = arith.constant 8.000000e+00 : f32
    %90 = vector.broadcast %cst_30 : f32 to vector<1x128xf32>
    %91 = arith.divf %89, %90 : vector<1x128xf32>
    %cst_31 = arith.constant dense<0.000000e+00> : vector<128xf32>
    %92 = vector.multi_reduction <add>, %80, %cst_31 [0] : vector<8x128xf32> to vector<128xf32>
    %93 = vector.shape_cast %92 : vector<128xf32> to vector<1x128xf32>
    %cst_32 = arith.constant 8.000000e+00 : f32
    %94 = vector.broadcast %cst_32 : f32 to vector<1x128xf32>
    %95 = arith.divf %93, %94 : vector<1x128xf32>
    %96 = vector.broadcast %91 : vector<1x128xf32> to vector<8x128xf32>
    %97 = arith.subf %42, %96 : vector<8x128xf32>
    %98 = vector.broadcast %95 : vector<1x128xf32> to vector<8x128xf32>
    %99 = arith.subf %80, %98 : vector<8x128xf32>
    %100 = arith.mulf %97, %97 : vector<8x128xf32>
    %cst_33 = arith.constant dense<0.000000e+00> : vector<128xf32>
    %101 = vector.multi_reduction <add>, %100, %cst_33 [0] : vector<8x128xf32> to vector<128xf32>
    %102 = vector.shape_cast %101 : vector<128xf32> to vector<1x128xf32>
    %103 = arith.mulf %99, %99 : vector<8x128xf32>
    %cst_34 = arith.constant dense<0.000000e+00> : vector<128xf32>
    %104 = vector.multi_reduction <add>, %103, %cst_34 [0] : vector<8x128xf32> to vector<128xf32>
    %105 = vector.shape_cast %104 : vector<128xf32> to vector<1x128xf32>
    %cst_35 = arith.constant 7.000000e+00 : f32
    %106 = vector.broadcast %cst_35 : f32 to vector<1x128xf32>
    %107 = arith.divf %102, %106 : vector<1x128xf32>
    %cst_36 = arith.constant 9.99999974E-5 : f32
    %108 = vector.broadcast %cst_36 : f32 to vector<1x128xf32>
    %109 = arith.addf %107, %108 : vector<1x128xf32>
    %110 = math.sqrt %109 : vector<1x128xf32>
    %cst_37 = arith.constant 7.000000e+00 : f32
    %111 = vector.broadcast %cst_37 : f32 to vector<1x128xf32>
    %112 = arith.divf %105, %111 : vector<1x128xf32>
    %cst_38 = arith.constant 9.99999974E-5 : f32
    %113 = vector.broadcast %cst_38 : f32 to vector<1x128xf32>
    %114 = arith.addf %112, %113 : vector<1x128xf32>
    %115 = math.sqrt %114 : vector<1x128xf32>
    %cst_39 = arith.constant 1.000000e+00 : f32
    %116 = vector.broadcast %cst_39 : f32 to vector<1x128xf32>
    %117 = arith.subf %116, %110 : vector<1x128xf32>
    %cst_40 = arith.constant 0.000000e+00 : f32
    %118 = vector.broadcast %cst_40 : f32 to vector<1x128xf32>
    %119 = arith.maximumf %117, %118 : vector<1x128xf32>
    %120 = vector.shape_cast %119 : vector<1x128xf32> to vector<1x1x128xf32>
    %cst_41 = arith.constant dense<0.000000e+00> : vector<1xf32>
    %121 = vector.multi_reduction <add>, %120, %cst_41 [1, 2] : vector<1x1x128xf32> to vector<1xf32>
    %122 = vector.shape_cast %121 : vector<1xf32> to vector<1x1x1xf32>
    %123 = vector.extract %122[0, 0, 0] : f32 from vector<1x1x1xf32>
    %cst_42 = arith.constant 1.280000e+02 : f32
    %124 = arith.divf %123, %cst_42 : f32
    %cst_43 = arith.constant 1.000000e+00 : f32
    %125 = vector.broadcast %cst_43 : f32 to vector<1x128xf32>
    %126 = arith.subf %125, %115 : vector<1x128xf32>
    %cst_44 = arith.constant 0.000000e+00 : f32
    %127 = vector.broadcast %cst_44 : f32 to vector<1x128xf32>
    %128 = arith.maximumf %126, %127 : vector<1x128xf32>
    %129 = vector.shape_cast %128 : vector<1x128xf32> to vector<1x1x128xf32>
    %cst_45 = arith.constant dense<0.000000e+00> : vector<1xf32>
    %130 = vector.multi_reduction <add>, %129, %cst_45 [1, 2] : vector<1x1x128xf32> to vector<1xf32>
    %131 = vector.shape_cast %130 : vector<1xf32> to vector<1x1x1xf32>
    %132 = vector.extract %131[0, 0, 0] : f32 from vector<1x1x1xf32>
    %cst_46 = arith.constant 1.280000e+02 : f32
    %133 = arith.divf %132, %cst_46 : f32
    %134 = arith.addf %124, %133 : f32
    %cst_47 = arith.constant dense<0.000000e+00> : vector<128x128xf32>
    %135 = tpu.matmul %97, %97, %cst_47 {dimension_numbers = #tpu.dot_dimension_numbers<[0], [0], [1], [1], [0, 1, 1, 1], [], []>, precision = #tpu.contract_precision<fp32>} : vector<8x128xf32>, vector<8x128xf32>, vector<128x128xf32> -> vector<128x128xf32>
    %cst_48 = arith.constant dense<0.000000e+00> : vector<128x128xf32>
    %136 = tpu.matmul %99, %99, %cst_48 {dimension_numbers = #tpu.dot_dimension_numbers<[0], [0], [1], [1], [0, 1, 1, 1], [], []>, precision = #tpu.contract_precision<fp32>} : vector<8x128xf32>, vector<8x128xf32>, vector<128x128xf32> -> vector<128x128xf32>
    %137 = arith.mulf %135, %135 : vector<128x128xf32>
    %138 = vector.shape_cast %137 : vector<128x128xf32> to vector<1x128x128xf32>
    %cst_49 = arith.constant dense<0.000000e+00> : vector<1xf32>
    %139 = vector.multi_reduction <add>, %138, %cst_49 [1, 2] : vector<1x128x128xf32> to vector<1xf32>
    %140 = vector.shape_cast %139 : vector<1xf32> to vector<1x1x1xf32>
    %141 = vector.extract %140[0, 0, 0] : f32 from vector<1x1x1xf32>
    %142 = arith.mulf %102, %102 : vector<1x128xf32>
    %143 = vector.shape_cast %142 : vector<1x128xf32> to vector<1x1x128xf32>
    %cst_50 = arith.constant dense<0.000000e+00> : vector<1xf32>
    %144 = vector.multi_reduction <add>, %143, %cst_50 [1, 2] : vector<1x1x128xf32> to vector<1xf32>
    %145 = vector.shape_cast %144 : vector<1xf32> to vector<1x1x1xf32>
    %146 = vector.extract %145[0, 0, 0] : f32 from vector<1x1x1xf32>
    %147 = arith.subf %141, %146 : f32
    %148 = arith.mulf %136, %136 : vector<128x128xf32>
    %149 = vector.shape_cast %148 : vector<128x128xf32> to vector<1x128x128xf32>
    %cst_51 = arith.constant dense<0.000000e+00> : vector<1xf32>
    %150 = vector.multi_reduction <add>, %149, %cst_51 [1, 2] : vector<1x128x128xf32> to vector<1xf32>
    %151 = vector.shape_cast %150 : vector<1xf32> to vector<1x1x1xf32>
    %152 = vector.extract %151[0, 0, 0] : f32 from vector<1x1x1xf32>
    %153 = arith.addf %147, %152 : f32
    %154 = arith.mulf %105, %105 : vector<1x128xf32>
    %155 = vector.shape_cast %154 : vector<1x128xf32> to vector<1x1x128xf32>
    %cst_52 = arith.constant dense<0.000000e+00> : vector<1xf32>
    %156 = vector.multi_reduction <add>, %155, %cst_52 [1, 2] : vector<1x1x128xf32> to vector<1xf32>
    %157 = vector.shape_cast %156 : vector<1xf32> to vector<1x1x1xf32>
    %158 = vector.extract %157[0, 0, 0] : f32 from vector<1x1x1xf32>
    %159 = arith.subf %153, %158 : f32
    %cst_53 = arith.constant 6.272000e+03 : f32
    %160 = arith.divf %159, %cst_53 : f32
    %cst_54 = arith.constant 2.500000e+01 : f32
    %161 = arith.mulf %cst_54, %87 : f32
    %cst_55 = arith.constant 2.500000e+01 : f32
    %162 = arith.mulf %cst_55, %134 : f32
    %163 = arith.addf %161, %162 : f32
    %cst_56 = arith.constant 1.000000e+00 : f32
    %164 = arith.mulf %cst_56, %160 : f32
    %165 = arith.addf %163, %164 : f32
    %c0_57 = arith.constant 0 : index
    %166 = memref.load %arg5[%c0_57] : memref<1xf32, #tpu.memory_space<smem>>
    memref.store %165, %arg5[%c0_57] : memref<1xf32, #tpu.memory_space<smem>>
    return
  }
}

</mosaic_0001>

<bundles_post_ra>
// kernel: tpu_custom_call.1
= control target key start
LH: loop header
LB: loop body
LE: loop exit
PB: predicated region body
PF: predicated region fallthrough
CT: control target
= control target key end

     0   :  { %10 = vsyncpa [#allocation3], 0  ;;  %s4885_s0 = inlined_call_operand.hbm [shape: f32[8,1024], index: 0, kind: input, shape index: {}]   ;;  %s4886_s1 = inlined_call_operand.hbm [shape: f32[8,1024], index: 1, kind: input, shape index: {}]   ;;  %s4887_s2 = inlined_call_operand.hbm [shape: bf16[1024,256], index: 2, kind: input, shape index: {}]   ;;  %s4888_s3 = inlined_call_operand.hbm [shape: bf16[128,256], index: 3, kind: input, shape index: {}]   ;;  %s4889_s4 = inlined_call_operand.hbm [shape: f32[8,128], index: 4, kind: input, shape index: {}]   ;;  %s4890_s5 = inlined_call_operand.hbm [shape: f32[1], index: 5, kind: output, shape index: {}]  }
   0x1   :  { %11 = vsyncpa [#allocation6], 0 }
   0x2   :  { %12 = vsyncpa [#allocation9], 0  ;;  %s30_s20 = sshll.u32 %s4886_s1, 4  ;;  %s31_s20 = int_to_ptr.hbm [resolvable:$true] %s30_s20 }
   0x3   :  { %13 = vsyncpa [#allocation4], 0  ;;  %s4166_s21 = smov [#allocation5]   ;;  %s53_s25 = sshll.u32 %s4888_s3, 4  ;;  %s54_s25 = int_to_ptr.hbm [resolvable:$true] %s53_s25 }
   0x4   :  { %s32_s22 = sshll.u32 %s4166_s21, 4  ;;  %s4167_s26 = smov [#allocation8]   ;;  %s33_s22 = int_to_ptr.vmem [resolvable:$true] %s32_s22 }
   0x5   :  { %35 = dma.hbm_to_vmem [thread:$0]  %s31_s20, 1024, %s33_s22, [#allocation6]  }
   0x6   :  { %s55_s27 = sshll.u32 %s4167_s26, 4  ;;  %s19_s30 = sshll.u32 %s4885_s0, 4  ;;  %s56_s27 = int_to_ptr.vmem [resolvable:$true] %s55_s27  ;;  %s20_s30 = int_to_ptr.hbm [resolvable:$true] %s19_s30 }
   0x7   :  { %s4168_s1 = smov 128   ;;  %s4169_s6 = smov 8  }
   0x8   :  { %61 = dma.hbm_to_vmem [thread:$0]  %s54_s25, 2048, %s56_s27, [#allocation9], %s4168_s1, %s4168_s1, %s4169_s6  }
   0x9   :  { %s40_s9 = sshll.u32 %s4887_s2, 4  ;;  %s4170_s10 = smov [#allocation2]   ;;  %s41_s9 = int_to_ptr.hbm [resolvable:$true] %s40_s9 }
   0xa   :  { %s21_s11 = sshll.u32 %s4170_s10, 4  ;;  %s4171_s3 = smov [#allocation7]   ;;  %s22_s11 = int_to_ptr.vmem [resolvable:$true] %s21_s11 }
   0xb   :  { %24 = dma.hbm_to_vmem [thread:$0]  %s20_s30, 1024, %s22_s11, [#allocation3]  }
   0xc   :  { %s42_s12 = sshll.u32 %s4171_s3, 4  ;;  %s67_s0 = sshll.u32 %s4889_s4, 4  ;;  %s43_s12 = int_to_ptr.vmem [resolvable:$true] %s42_s12  ;;  %s68_s0 = int_to_ptr.hbm [resolvable:$true] %s67_s0 }
   0xd   :  { %48 = dma.hbm_to_vmem [thread:$0]  %s41_s9, 16384, %s43_s12, [#allocation6], %s4168_s1, %s4168_s1, %s4169_s6  }
   0xe   :  { %s4172_s15 = smov [#allocation10]  }
   0xf   :  { %s69_s16 = sshll.u32 %s4172_s15, 4  ;;  %s70_s16 = int_to_ptr.vmem [resolvable:$true] %s69_s16 }
  0x10   :  { %72 = dma.hbm_to_vmem [thread:$0]  %s68_s0, 128, %s70_s16, [#allocation9]  }
  0x11   :  { %4158 = dma.done.wait [#allocation3], 1024  }
  0x12   :  { %4159 = vsyncadd [#allocation3], 4294966272 }
  0x13   :  { %4160 = dma.done.wait [#allocation6], 17408  }
  0x14   :  { %4161 = vsyncadd [#allocation6], 4294949888 }
  0x15   :  { %4162 = dma.done.wait [#allocation9], 2176  }
  0x16   :  { %4163 = vsyncadd [#allocation9], 4294965120  ;;  %v3281_v0 = vld [vmem:[#allocation7 + $0x70] sm:$0xf]  ;;  %v3834_v1 = vld [vmem:[#allocation7 + $0x74] sm:$0xf0] }
  0x17   :  { %v3313_v2 = vld [vmem:[#allocation7 + $0xf0] sm:$0xf]  ;;  %v3282_v3 = vor.u32 %v3834_v1, %v3281_v0  ;;  %v3842_v4 = vld [vmem:[#allocation7 + $0xf4] sm:$0xf0]  ;;  %v3277_v11 = vld [vmem:[#allocation7 + $0x60] sm:$0xf] }
  0x18   :  { %v3345_v5 = vld [vmem:[#allocation7 + $0x170] sm:$0xf]  ;;  %v3850_v6 = vld [vmem:[#allocation7 + $0x174] sm:$0xf0]  ;;  %v3314_v7 = vor.u32 %v3842_v4, %v3313_v2  ;;  %v3833_v13 = vld [vmem:[#allocation7 + $0x64] sm:$0xf0] }
  0x19   :  { %v3346_v8 = vor.u32 %v3850_v6, %v3345_v5  ;;  %v3377_v9 = vld [vmem:[#allocation7 + $0x1f0] sm:$0xf]  ;;  %v3858_v10 = vld [vmem:[#allocation7 + $0x1f4] sm:$0xf0]  ;;  %783 = vmatpush.bf16.msra.mxu0 %v3282_v3  ;;  %v3309_v14 = vld [vmem:[#allocation7 + $0xe0] sm:$0xf]  ;;  %v3278_v16 = vor.u32 %v3833_v13, %v3277_v11 }
  0x1a   :  { %v3378_v12 = vor.u32 %v3858_v10, %v3377_v9  ;;  %v3841_v15 = vld [vmem:[#allocation7 + $0xe4] sm:$0xf0]  ;;  %796 = vmatpush.bf16.msra.mxu1 %v3314_v7  ;;  %v3341_v18 = vld [vmem:[#allocation7 + $0x160] sm:$0xf]  ;;  %v3273_v23 = vld [vmem:[#allocation7 + $0x50] sm:$0xf] }
  0x1b   :  { %809 = vmatpush.bf16.msra.mxu2 %v3346_v8  ;;  %v3310_v17 = vor.u32 %v3841_v15, %v3309_v14  ;;  %v3849_v19 = vld [vmem:[#allocation7 + $0x164] sm:$0xf0]  ;;  %v3373_v20 = vld [vmem:[#allocation7 + $0x1e0] sm:$0xf]  ;;  %v3832_v24 = vld [vmem:[#allocation7 + $0x54] sm:$0xf0] }
  0x1c   :  { %822 = vmatpush.bf16.msra.mxu3 %v3378_v12  ;;  %v3342_v21 = vor.u32 %v3849_v19, %v3341_v18  ;;  %v3857_v22 = vld [vmem:[#allocation7 + $0x1e4] sm:$0xf0]  ;;  %v3305_v26 = vld [vmem:[#allocation7 + $0xd0] sm:$0xf]  ;;  %v3840_v27 = vld [vmem:[#allocation7 + $0xd4] sm:$0xf0]  ;;  %v3274_v29 = vor.u32 %v3832_v24, %v3273_v23 }
  0x1d   :  { %v3374_v25 = vor.u32 %v3857_v22, %v3373_v20  ;;  %v3337_v28 = vld [vmem:[#allocation7 + $0x150] sm:$0xf]  ;;  %784 = vmatpush.bf16.msra.mxu0 %v3278_v16  ;;  %v3848_v30 = vld [vmem:[#allocation7 + $0x154] sm:$0xf0]  ;;  %v3306_v33 = vor.u32 %v3840_v27, %v3305_v26  ;;  %v3269_v35 = vld [vmem:[#allocation7 + $0x40] sm:$0xf] }
  0x1e   :  { %v3369_v31 = vld [vmem:[#allocation7 + $0x1d0] sm:$0xf]  ;;  %v3856_v32 = vld [vmem:[#allocation7 + $0x1d4] sm:$0xf0]  ;;  %797 = vmatpush.bf16.msra.mxu1 %v3310_v17  ;;  %v3338_v34 = vor.u32 %v3848_v30, %v3337_v28  ;;  %v3831_v36 = vld [vmem:[#allocation7 + $0x44] sm:$0xf0] }
  0x1f   :  { %810 = vmatpush.bf16.msra.mxu2 %v3342_v21  ;;  %v3301_v37 = vld [vmem:[#allocation7 + $0xc0] sm:$0xf]  ;;  %v3370_v38 = vor.u32 %v3856_v32, %v3369_v31  ;;  %v3839_v39 = vld [vmem:[#allocation7 + $0xc4] sm:$0xf0]  ;;  %v3270_v44 = vor.u32 %v3831_v36, %v3269_v35  ;;  %v3265_v47 = vld [vmem:[#allocation7 + $0x30] sm:$0xf] }
  0x20   :  { %823 = vmatpush.bf16.msra.mxu3 %v3374_v25  ;;  %v3333_v40 = vld [vmem:[#allocation7 + $0x140] sm:$0xf]  ;;  %v3847_v41 = vld [vmem:[#allocation7 + $0x144] sm:$0xf0]  ;;  %v3302_v45 = vor.u32 %v3839_v39, %v3301_v37  ;;  %v3830_v48 = vld [vmem:[#allocation7 + $0x34] sm:$0xf0] }
  0x21   :  { %v3365_v42 = vld [vmem:[#allocation7 + $0x1c0] sm:$0xf]  ;;  %v3855_v43 = vld [vmem:[#allocation7 + $0x1c4] sm:$0xf0]  ;;  %785 = vmatpush.bf16.msra.mxu0 %v3274_v29  ;;  %v3334_v46 = vor.u32 %v3847_v41, %v3333_v40  ;;  %v3297_v49 = vld [vmem:[#allocation7 + $0xb0] sm:$0xf]  ;;  %v3266_v56 = vor.u32 %v3830_v48, %v3265_v47 }
  0x22   :  { %798 = vmatpush.bf16.msra.mxu1 %v3306_v33  ;;  %v3366_v50 = vor.u32 %v3855_v43, %v3365_v42  ;;  %v3838_v51 = vld [vmem:[#allocation7 + $0xb4] sm:$0xf0]  ;;  %v3329_v52 = vld [vmem:[#allocation7 + $0x130] sm:$0xf]  ;;  %v3261_v59 = vld [vmem:[#allocation7 + $0x20] sm:$0xf] }
  0x23   :  { %811 = vmatpush.bf16.msra.mxu2 %v3338_v34  ;;  %v3846_v53 = vld [vmem:[#allocation7 + $0x134] sm:$0xf0]  ;;  %v3361_v54 = vld [vmem:[#allocation7 + $0x1b0] sm:$0xf]  ;;  %v3298_v57 = vor.u32 %v3838_v51, %v3297_v49  ;;  %v3829_v60 = vld [vmem:[#allocation7 + $0x24] sm:$0xf0] }
  0x24   :  { %824 = vmatpush.bf16.msra.mxu3 %v3370_v38  ;;  %v3854_v55 = vld [vmem:[#allocation7 + $0x1b4] sm:$0xf0]  ;;  %v3330_v58 = vor.u32 %v3846_v53, %v3329_v52  ;;  %v3293_v61 = vld [vmem:[#allocation7 + $0xa0] sm:$0xf]  ;;  %v3837_v63 = vld [vmem:[#allocation7 + $0xa4] sm:$0xf0]  ;;  %v3262_v4 = vor.u32 %v3829_v60, %v3261_v59 }
  0x25   :  { %786 = vmatpush.bf16.msra.mxu0 %v3270_v44  ;;  %v3362_v62 = vor.u32 %v3854_v55, %v3361_v54  ;;  %v3325_v0 = vld [vmem:[#allocation7 + $0x120] sm:$0xf]  ;;  %v3845_v1 = vld [vmem:[#allocation7 + $0x124] sm:$0xf0]  ;;  %v3294_v5 = vor.u32 %v3837_v63, %v3293_v61  ;;  %v3257_v7 = vld [vmem:[#allocation7 + $0x10] sm:$0xf] }
  0x26   :  { %799 = vmatpush.bf16.msra.mxu1 %v3302_v45  ;;  %v3357_v2 = vld [vmem:[#allocation7 + $0x1a0] sm:$0xf]  ;;  %v3853_v3 = vld [vmem:[#allocation7 + $0x1a4] sm:$0xf0]  ;;  %v3326_v6 = vor.u32 %v3845_v1, %v3325_v0  ;;  %v3828_v8 = vld [vmem:[#allocation7 + $0x14] sm:$0xf0] }
  0x27   :  { %812 = vmatpush.bf16.msra.mxu2 %v3334_v46  ;;  %v3289_v9 = vld [vmem:[#allocation7 + $0x90] sm:$0xf]  ;;  %v3358_v10 = vor.u32 %v3853_v3, %v3357_v2  ;;  %v3836_v11 = vld [vmem:[#allocation7 + $0x94] sm:$0xf0]  ;;  %v3258_v16 = vor.u32 %v3828_v8, %v3257_v7  ;;  %v3253_v17 = vld [vmem:[#allocation7] sm:$0xf] }
  0x28   :  { %825 = vmatpush.bf16.msra.mxu3 %v3366_v50  ;;  %v3321_v12 = vld [vmem:[#allocation7 + $0x110] sm:$0xf]  ;;  %v3844_v13 = vld [vmem:[#allocation7 + $0x114] sm:$0xf0]  ;;  %v3827_v18 = vld [vmem:[#allocation7 + $0x4] sm:$0xf0]  ;;  %v3290_v19 = vor.u32 %v3836_v11, %v3289_v9 }
  0x29   :  { %787 = vmatpush.bf16.msra.mxu0 %v3266_v56  ;;  %v3353_v14 = vld [vmem:[#allocation7 + $0x190] sm:$0xf]  ;;  %v3852_v15 = vld [vmem:[#allocation7 + $0x194] sm:$0xf0]  ;;  %v3322_v20 = vor.u32 %v3844_v13, %v3321_v12  ;;  %v3285_v21 = vld [vmem:[#allocation7 + $0x80] sm:$0xf]  ;;  %v3254_v31 = vor.u32 %v3827_v18, %v3253_v17 }
  0x2a   :  { %800 = vmatpush.bf16.msra.mxu1 %v3298_v57  ;;  %v3835_v22 = vld [vmem:[#allocation7 + $0x84] sm:$0xf0]  ;;  %v3317_v23 = vld [vmem:[#allocation7 + $0x100] sm:$0xf]  ;;  %v3354_v24 = vor.u32 %v3852_v15, %v3353_v14  ;;  %v3409_v28 = vld [vmem:[#allocation7 + $0x270] sm:$0xf] }
  0x2b   :  { %813 = vmatpush.bf16.msra.mxu2 %v3330_v58  ;;  %v3843_v25 = vld [vmem:[#allocation7 + $0x104] sm:$0xf0]  ;;  %v3349_v26 = vld [vmem:[#allocation7 + $0x180] sm:$0xf]  ;;  %v3866_v29 = vld [vmem:[#allocation7 + $0x274] sm:$0xf0]  ;;  %v3286_v35 = vor.u32 %v3835_v22, %v3285_v21 }
  0x2c   :  { %826 = vmatpush.bf16.msra.mxu3 %v3362_v62  ;;  %v3851_v27 = vld [vmem:[#allocation7 + $0x184] sm:$0xf0]  ;;  %v3441_v30 = vld [vmem:[#allocation7 + $0x2f0] sm:$0xf]  ;;  %v3874_v32 = vld [vmem:[#allocation7 + $0x2f4] sm:$0xf0]  ;;  %v3318_v36 = vor.u32 %v3843_v25, %v3317_v23  ;;  %v3410_v41 = vor.u32 %v3866_v29, %v3409_v28 }
  0x2d   :  { %788 = vmatpush.bf16.msra.mxu0 %v3262_v4  ;;  %v3473_v33 = vld [vmem:[#allocation7 + $0x370] sm:$0xf]  ;;  %v3882_v34 = vld [vmem:[#allocation7 + $0x374] sm:$0xf0]  ;;  %v3350_v40 = vor.u32 %v3851_v27, %v3349_v26  ;;  %v3405_v42 = vld [vmem:[#allocation7 + $0x260] sm:$0xf]  ;;  %v3442_v45 = vor.u32 %v3874_v32, %v3441_v30 }
  0x2e   :  { %801 = vmatpush.bf16.msra.mxu1 %v3294_v5  ;;  %v3505_v37 = vld [vmem:[#allocation7 + $0x3f0] sm:$0xf]  ;;  %v3890_v38 = vld [vmem:[#allocation7 + $0x3f4] sm:$0xf0]  ;;  %v3865_v43 = vld [vmem:[#allocation7 + $0x264] sm:$0xf0]  ;;  %v3474_v46 = vor.u32 %v3882_v34, %v3473_v33 }
  0x2f   :  { %814 = vmatpush.bf16.msra.mxu2 %v3326_v6  ;;  %v384_v39 = vld [vmem:[#allocation2 + $0x10] sm:$0xff]  ;;  %v382_v44 = vld [vmem:[#allocation2] sm:$0xff]  ;;  %v385_v48 = vld [vmem:[#allocation2 + $0x18] sm:$0xff]  ;;  %v3506_v50 = vor.u32 %v3890_v38, %v3505_v37  ;;  %v3406_v59 = vor.u32 %v3865_v43, %v3405_v42  ;;  %vm1762_vm7 = vcmask 64512   ;;  %vm1688_vm11 = vcmask 1040384   ;;  %s3238_s10 = sshll.u32 %s4890_s5, 4  ;;  %s3239_s10 = int_to_ptr.hbm [resolvable:$true] %s3238_s10 }
  0x30   :  { %827 = vmatpush.bf16.msra.mxu3 %v3358_v10  ;;  %v3437_v47 = vld [vmem:[#allocation7 + $0x2e0] sm:$0xf]  ;;  %v383_v49 = vld [vmem:[#allocation2 + $0x8] sm:$0xff]  ;;  %v392_v54 = vpack.c.bf16 %v384_v39, %v384_v39  ;;  %v390_v57 = vpack.c.bf16 %v382_v44, %v382_v44  ;;  %v393_v58 = vpack.c.bf16 %v385_v48, %v385_v48  ;;  %v3401_v63 = vld [vmem:[#allocation7 + $0x250] sm:$0xf]  ;;  %s4178_s13 = smov [#allocation11]  }
  0x31   :  { %789 = vmatpush.bf16.msra.mxu0 %v3258_v16  ;;  %v3873_v51 = vld [vmem:[#allocation7 + $0x2e4] sm:$0xf0]  ;;  %v3469_v52 = vld [vmem:[#allocation7 + $0x360] sm:$0xf]  ;;  %v391_v60 = vpack.c.bf16 %v383_v49, %v383_v49  ;;  %v3864_v0 = vld [vmem:[#allocation7 + $0x254] sm:$0xf0] }
  0x32   :  { %802 = vmatpush.bf16.msra.mxu1 %v3290_v19  ;;  %v3881_v53 = vld [vmem:[#allocation7 + $0x364] sm:$0xf0]  ;;  %v3501_v55 = vld [vmem:[#allocation7 + $0x3e0] sm:$0xf]  ;;  %v3438_v61 = vor.u32 %v3873_v51, %v3437_v47  ;;  %v3433_v1 = vld [vmem:[#allocation7 + $0x2d0] sm:$0xf]  ;;  %v3402_v8 = vor.u32 %v3864_v0, %v3401_v63 }
  0x33   :  { %815 = vmatpush.bf16.msra.mxu2 %v3322_v20  ;;  %v3889_v56 = vld [vmem:[#allocation7 + $0x3e4] sm:$0xf0]  ;;  %v3470_v62 = vor.u32 %v3881_v53, %v3469_v52  ;;  %v3872_v3 = vld [vmem:[#allocation7 + $0x2d4] sm:$0xf0]  ;;  %v3465_v4 = vld [vmem:[#allocation7 + $0x350] sm:$0xf] }
  0x34   :  { %828 = vmatpush.bf16.msra.mxu3 %v3354_v24  ;;  %v3502_v2 = vor.u32 %v3889_v56, %v3501_v55  ;;  %v3880_v5 = vld [vmem:[#allocation7 + $0x354] sm:$0xf0]  ;;  %v3497_v6 = vld [vmem:[#allocation7 + $0x3d0] sm:$0xf]  ;;  %v3434_v9 = vor.u32 %v3872_v3, %v3433_v1  ;;  %v3397_v11 = vld [vmem:[#allocation7 + $0x240] sm:$0xf] }
  0x35   :  { %790 = vmatpush.bf16.msra.mxu0 %v3254_v31  ;;  %v3888_v7 = vld [vmem:[#allocation7 + $0x3d4] sm:$0xf0]  ;;  %v3466_v10 = vor.u32 %v3880_v5, %v3465_v4  ;;  %v3863_v12 = vld [vmem:[#allocation7 + $0x244] sm:$0xf0]  ;;  %v3429_v13 = vld [vmem:[#allocation7 + $0x2c0] sm:$0xf] }
  0x36   :  { %803 = vmatpush.bf16.msra.mxu1 %v3286_v35  ;;  %v3498_v14 = vor.u32 %v3888_v7, %v3497_v6  ;;  %v3871_v15 = vld [vmem:[#allocation7 + $0x2c4] sm:$0xf0]  ;;  %v3461_v16 = vld [vmem:[#allocation7 + $0x340] sm:$0xf]  ;;  %v3398_v20 = vor.u32 %v3863_v12, %v3397_v11  ;;  %v3393_v23 = vld [vmem:[#allocation7 + $0x230] sm:$0xf] }
  0x37   :  { %816 = vmatpush.bf16.msra.mxu2 %v3318_v36  ;;  %v3879_v17 = vld [vmem:[#allocation7 + $0x344] sm:$0xf0]  ;;  %v3493_v18 = vld [vmem:[#allocation7 + $0x3c0] sm:$0xf]  ;;  %v3430_v21 = vor.u32 %v3871_v15, %v3429_v13  ;;  %v3862_v24 = vld [vmem:[#allocation7 + $0x234] sm:$0xf0] }
  0x38   :  { %829 = vmatpush.bf16.msra.mxu3 %v3350_v40  ;;  %791 = vmatmul.bf16.vlgmr.msra.gmra.mxu0 %v390_v57  ;;  %v3887_v19 = vld [vmem:[#allocation7 + $0x3c4] sm:$0xf0]  ;;  %v3462_v22 = vor.u32 %v3879_v17, %v3461_v16  ;;  %v3425_v25 = vld [vmem:[#allocation7 + $0x2b0] sm:$0xf]  ;;  %v3870_v27 = vld [vmem:[#allocation7 + $0x2b4] sm:$0xf0]  ;;  %v3394_v32 = vor.u32 %v3862_v24, %v3393_v23 }
  0x39   :  { %835 = vmatpush.bf16.msrb.mxu0 %v3410_v41  ;;  %804 = vmatmul.bf16.vlgmr.msra.gmra.mxu1 %v391_v60  ;;  %v3494_v26 = vor.u32 %v3887_v19, %v3493_v18  ;;  %v3457_v28 = vld [vmem:[#allocation7 + $0x330] sm:$0xf]  ;;  %v3878_v29 = vld [vmem:[#allocation7 + $0x334] sm:$0xf0]  ;;  %v3426_v33 = vor.u32 %v3870_v27, %v3425_v25  ;;  %v3389_v35 = vld [vmem:[#allocation7 + $0x220] sm:$0xf] }
  0x3a   :  { %848 = vmatpush.bf16.msrb.mxu1 %v3442_v45  ;;  %817 = vmatmul.bf16.vlgmr.msra.gmra.mxu2 %v392_v54  ;;  %v3489_v30 = vld [vmem:[#allocation7 + $0x3b0] sm:$0xf]  ;;  %v3886_v31 = vld [vmem:[#allocation7 + $0x3b4] sm:$0xf0]  ;;  %v3458_v34 = vor.u32 %v3878_v29, %v3457_v28  ;;  %v3861_v36 = vld [vmem:[#allocation7 + $0x224] sm:$0xf0] }
  0x3b   :  { %861 = vmatpush.bf16.msrb.mxu2 %v3474_v46  ;;  %830 = vmatmul.bf16.vlgmr.msra.gmra.mxu3 %v393_v58  ;;  %v3421_v37 = vld [vmem:[#allocation7 + $0x2a0] sm:$0xf]  ;;  %v3490_v38 = vor.u32 %v3886_v31, %v3489_v30  ;;  %v3869_v39 = vld [vmem:[#allocation7 + $0x2a4] sm:$0xf0]  ;;  %v3390_v44 = vor.u32 %v3861_v36, %v3389_v35  ;;  %v3385_v47 = vld [vmem:[#allocation7 + $0x210] sm:$0xf] }
  0x3c   :  { %874 = vmatpush.bf16.msrb.mxu3 %v3506_v50  ;;  %v3453_v40 = vld [vmem:[#allocation7 + $0x320] sm:$0xf]  ;;  %v3877_v41 = vld [vmem:[#allocation7 + $0x324] sm:$0xf0]  ;;  %v3422_v45 = vor.u32 %v3869_v39, %v3421_v37  ;;  %v3860_v48 = vld [vmem:[#allocation7 + $0x214] sm:$0xf0] }
  0x3d   :  { %836 = vmatpush.bf16.msrb.mxu0 %v3406_v59  ;;  %v3485_v42 = vld [vmem:[#allocation7 + $0x3a0] sm:$0xf]  ;;  %v3885_v43 = vld [vmem:[#allocation7 + $0x3a4] sm:$0xf0]  ;;  %v3454_v46 = vor.u32 %v3877_v41, %v3453_v40  ;;  %v3417_v49 = vld [vmem:[#allocation7 + $0x290] sm:$0xf]  ;;  %v3386_v56 = vor.u32 %v3860_v48, %v3385_v47 }
  0x3e   :  { %849 = vmatpush.bf16.msrb.mxu1 %v3438_v61  ;;  %v3486_v50 = vor.u32 %v3885_v43, %v3485_v42  ;;  %v3868_v51 = vld [vmem:[#allocation7 + $0x294] sm:$0xf0]  ;;  %v3449_v52 = vld [vmem:[#allocation7 + $0x310] sm:$0xf]  ;;  %v3381_v59 = vld [vmem:[#allocation7 + $0x200] sm:$0xf] }
  0x3f   :  { %862 = vmatpush.bf16.msrb.mxu2 %v3470_v62  ;;  %v3876_v53 = vld [vmem:[#allocation7 + $0x314] sm:$0xf0]  ;;  %v3481_v54 = vld [vmem:[#allocation7 + $0x390] sm:$0xf]  ;;  %v3418_v57 = vor.u32 %v3868_v51, %v3417_v49  ;;  %v3859_v60 = vld [vmem:[#allocation7 + $0x204] sm:$0xf0] }
  0x40   :  { %875 = vmatpush.bf16.msrb.mxu3 %v3502_v2  ;;  %v3884_v55 = vld [vmem:[#allocation7 + $0x394] sm:$0xf0]  ;;  %v3450_v58 = vor.u32 %v3876_v53, %v3449_v52  ;;  %v3413_v61 = vld [vmem:[#allocation7 + $0x280] sm:$0xf]  ;;  %v3867_v63 = vld [vmem:[#allocation7 + $0x284] sm:$0xf0]  ;;  %v3382_v4 = vor.u32 %v3859_v60, %v3381_v59 }
  0x41   :  { %837 = vmatpush.bf16.msrb.mxu0 %v3402_v8  ;;  %v3482_v62 = vor.u32 %v3884_v55, %v3481_v54  ;;  %v3445_v0 = vld [vmem:[#allocation7 + $0x300] sm:$0xf]  ;;  %v3875_v1 = vld [vmem:[#allocation7 + $0x304] sm:$0xf0]  ;;  %v3414_v6 = vor.u32 %v3867_v63, %v3413_v61  ;;  %v389_v11 = vld [vmem:[#allocation2 + $0x38] sm:$0xff] }
  0x42   :  { %850 = vmatpush.bf16.msrb.mxu1 %v3434_v9  ;;  %v3477_v2 = vld [vmem:[#allocation7 + $0x380] sm:$0xf]  ;;  %v3883_v3 = vld [vmem:[#allocation7 + $0x384] sm:$0xf0]  ;;  %v3446_v7 = vor.u32 %v3875_v1, %v3445_v0  ;;  %v388_v9 = vld [vmem:[#allocation2 + $0x30] sm:$0xff]  ;;  %v397_v15 = vpack.c.bf16 %v389_v11, %v389_v11 }
  0x43   :  { %863 = vmatpush.bf16.msrb.mxu2 %v3466_v10  ;;  %v386_v5 = vld [vmem:[#allocation2 + $0x20] sm:$0xff]  ;;  %v387_v8 = vld [vmem:[#allocation2 + $0x28] sm:$0xff]  ;;  %v3478_v10 = vor.u32 %v3883_v3, %v3477_v2  ;;  %v3537_v27 = vld [vmem:[#allocation8 + $0x70] sm:$0xf] }
  0x44   :  { %876 = vmatpush.bf16.msrb.mxu3 %v3498_v14  ;;  %v394_v12 = vpack.c.bf16 %v386_v5, %v386_v5  ;;  %v395_v13 = vpack.c.bf16 %v387_v8, %v387_v8  ;;  %v396_v14 = vpack.c.bf16 %v388_v9, %v388_v9  ;;  %v3962_v28 = vld [vmem:[#allocation8 + $0x74] sm:$0xf0]  ;;  %v3533_v31 = vld [vmem:[#allocation8 + $0x60] sm:$0xf]  ;;  %v3529_v36 = vld [vmem:[#allocation8 + $0x50] sm:$0xf] }
  0x45   :  { %838 = vmatpush.bf16.msrb.mxu0 %v3398_v20  ;;  %v3538_v29 = vor.u32 %v3962_v28, %v3537_v27  ;;  %v3960_v37 = vld [vmem:[#allocation8 + $0x54] sm:$0xf0]  ;;  %v3601_v42 = vld [vmem:[#allocation7 + $0xf4] sm:$0xf]  ;;  %v3906_v43 = vld [vmem:[#allocation7 + $0xf8] sm:$0xf0] }
  0x46   :  { %851 = vmatpush.bf16.msrb.mxu1 %v3430_v21  ;;  %v4224_v21 = vld [vmem:[#allocation10] sm:$0xff]  ;;  %v3959_v47 = vld [vmem:[#allocation8 + $0x44] sm:$0xf0]  ;;  %v3914_v51 = vld [vmem:[#allocation7 + $0x178] sm:$0xf0] }
  0x47   :  { %864 = vmatpush.bf16.msrb.mxu2 %v3462_v22  ;;  %v398_v23 = vperm.slane %v4224_v21, 0  ;;  %v3569_v54 = vld [vmem:[#allocation7 + $0x74] sm:$0xf]  ;;  %v3898_v55 = vld [vmem:[#allocation7 + $0x78] sm:$0xf0] }
  0x48   :  { %877 = vmatpush.bf16.msrb.mxu3 %v3494_v26  ;;  %v3521_v59 = vld [vmem:[#allocation8 + $0x30] sm:$0xf]  ;;  %v3958_v60 = vld [vmem:[#allocation8 + $0x34] sm:$0xf0]  ;;  %v3629_v0 = vld [vmem:[#allocation7 + $0x164] sm:$0xf] }
  0x49   :  { %839 = vmatpush.bf16.msrb.mxu0 %v3394_v32  ;;  %v3961_v32 = vld [vmem:[#allocation8 + $0x64] sm:$0xf0]  ;;  %v3522_v63 = vor.u32 %v3958_v60, %v3521_v59  ;;  %v3913_v1 = vld [vmem:[#allocation7 + $0x168] sm:$0xf0]  ;;  %v3565_v8 = vld [vmem:[#allocation7 + $0x64] sm:$0xf] }
  0x4a   :  { %852 = vmatpush.bf16.msrb.mxu1 %v3426_v33  ;;  %v4173_v33 = vmov 8.0   ;;  %v3897_v9 = vld [vmem:[#allocation7 + $0x68] sm:$0xf0]  ;;  %v3589_v28 = vld [vmem:[#allocation7 + $0xc4] sm:$0xf] }
  0x4b   :  { %865 = vmatpush.bf16.msrb.mxu2 %v3458_v34  ;;  %4007 = vrcp.f32 %v4173_v33  ;;  %v3534_v34 = vor.u32 %v3961_v32, %v3533_v31  ;;  %v3956_v33 = vld [vmem:[#allocation8 + $0x14] sm:$0xf0]  ;;  %v3553_v60 = vld [vmem:[#allocation7 + $0x34] sm:$0xf] }
  0x4c   :  { %878 = vmatpush.bf16.msrb.mxu3 %v3490_v38  ;;  %v3530_v38 = vor.u32 %v3960_v37, %v3529_v36 }
  0x4d   :  { %840 = vmatpush.bf16.msrb.mxu0 %v3390_v44 }
  0x4e   :  { %853 = vmatpush.bf16.msrb.mxu1 %v3422_v45  ;;  %v3602_v45 = vor.u32 %v3906_v43, %v3601_v42  ;;  %v3557_v42 = vld [vmem:[#allocation7 + $0x44] sm:$0xf]  ;;  %v3895_v43 = vld [vmem:[#allocation7 + $0x48] sm:$0xf0] }
  0x4f   :  { %866 = vmatpush.bf16.msrb.mxu2 %v3454_v46  ;;  %v3525_v46 = vld [vmem:[#allocation8 + $0x40] sm:$0xf] }
  0x50   :  { %879 = vmatpush.bf16.msrb.mxu3 %v3486_v50  ;;  %v3526_v49 = vor.u32 %v3959_v47, %v3525_v46  ;;  %v3633_v50 = vld [vmem:[#allocation7 + $0x174] sm:$0xf]  ;;  %v3902_v47 = vld [vmem:[#allocation7 + $0xb8] sm:$0xf0] }
  0x51   :  { %841 = vmatpush.bf16.msrb.mxu0 %v3386_v56  ;;  %v4227_v39 = vpop.eup %4007  ;;  %v3634_v53 = vor.u32 %v3914_v51, %v3633_v50  ;;  %v3597_v56 = vld [vmem:[#allocation7 + $0xe4] sm:$0xf]  ;;  %v3585_v46 = vld [vmem:[#allocation7 + $0xb4] sm:$0xf]  ;;  %v3955_v51 = vld [vmem:[#allocation8 + $0x4] sm:$0xf0] }
  0x52   :  { %854 = vmatpush.bf16.msrb.mxu1 %v3418_v57  ;;  %v894_v52 = vmul.f32 8.0, %v4227_v39  ;;  %v3570_v57 = vor.u32 %v3898_v55, %v3569_v54  ;;  %vm898_vm0 = vweird.f32 %v4227_v39  ;;  %v3586_v50 = vor.u32 %v3902_v47, %v3585_v46  ;;  %v3541_v46 = vld [vmem:[#allocation7 + $0x4] sm:$0xf]  ;;  %v3891_v47 = vld [vmem:[#allocation7 + $0x8] sm:$0xf0] }
  0x53   :  { %867 = vmatpush.bf16.msrb.mxu2 %v3450_v58  ;;  %v3905_v58 = vld [vmem:[#allocation7 + $0xe8] sm:$0xf0] }
  0x54   :  { %880 = vmatpush.bf16.msrb.mxu3 %v3482_v62  ;;  %v3598_v62 = vor.u32 %v3905_v58, %v3597_v56  ;;  %v895_v3 = vsub.f32 1.0, %v894_v52  ;;  %v3617_v52 = vld [vmem:[#allocation7 + $0x134] sm:$0xf] }
  0x55   :  { %842 = vmatpush.bf16.msrb.mxu0 %v3382_v4  ;;  %v3630_v4 = vor.u32 %v3913_v1, %v3629_v0  ;;  %v3665_v56 = vld [vmem:[#allocation7 + $0x1f4] sm:$0xf]  ;;  %v3581_v0 = vld [vmem:[#allocation7 + $0xa4] sm:$0xf]  ;;  %v3901_v1 = vld [vmem:[#allocation7 + $0xa8] sm:$0xf0] }
  0x56   :  { %855 = vmatpush.bf16.msrb.mxu1 %v3414_v6 }
  0x57   :  { %868 = vmatpush.bf16.msrb.mxu2 %v3446_v7 }
  0x58   :  { %881 = vmatpush.bf16.msrb.mxu3 %v3478_v10  ;;  %843 = vmatmul.bf16.vlgmr.msrb.gmra.mxu0 %v394_v12  ;;  %v3593_v10 = vld [vmem:[#allocation7 + $0xd4] sm:$0xf]  ;;  %v3566_v12 = vor.u32 %v3897_v9, %v3565_v8  ;;  %v3921_v8 = vld [vmem:[#allocation7 + $0x1e8] sm:$0xf0] }
  0x59   :  { %856 = vmatmul.bf16.vlgmr.msrb.gmra.mxu1 %v395_v13  ;;  %982 = vmatpush.bf16.msra.mxu0 %v3538_v29  ;;  %v3904_v13 = vld [vmem:[#allocation7 + $0xd8] sm:$0xf0]  ;;  %v3903_v29 = vld [vmem:[#allocation7 + $0xc8] sm:$0xf0] }
  0x5a   :  { %869 = vmatmul.bf16.vlgmr.msrb.gmra.mxu2 %v396_v14  ;;  %1396 = vmatpush.bf16.msra.mxu1 %v3570_v57  ;;  %v3517_v14 = vld [vmem:[#allocation8 + $0x20] sm:$0xf]  ;;  %v3590_v32 = vor.u32 %v3903_v29, %v3589_v28  ;;  %v3922_v57 = vld [vmem:[#allocation7 + $0x1f8] sm:$0xf0]  ;;  %v3573_v28 = vld [vmem:[#allocation7 + $0x84] sm:$0xf] }
  0x5b   :  { %882 = vmatmul.bf16.vlgmr.msrb.gmra.mxu3 %v397_v15  ;;  %1409 = vmatpush.bf16.msra.mxu2 %v3602_v45  ;;  %v3957_v15 = vld [vmem:[#allocation8 + $0x24] sm:$0xf0]  ;;  %v3558_v45 = vor.u32 %v3895_v43, %v3557_v42  ;;  %v3666_v59 = vor.u32 %v3922_v57, %v3665_v56  ;;  %v3761_v42 = vld [vmem:[#allocation7 + $0x374] sm:$0xf] }
  0x5c   :  { %1422 = vmatpush.bf16.msra.mxu3 %v3634_v53  ;;  %v3910_v53 = vld [vmem:[#allocation7 + $0x138] sm:$0xf0]  ;;  %v3649_v56 = vld [vmem:[#allocation7 + $0x1b4] sm:$0xf] }
  0x5d   :  { %983 = vmatpush.bf16.msra.mxu0 %v3534_v34  ;;  %v3621_v34 = vld [vmem:[#allocation7 + $0x144] sm:$0xf]  ;;  %v3618_v55 = vor.u32 %v3910_v53, %v3617_v52 }
  0x5e   :  { %1397 = vmatpush.bf16.msra.mxu1 %v3566_v12  ;;  %v3577_v12 = vld [vmem:[#allocation7 + $0x94] sm:$0xf]  ;;  %v3725_v52 = vld [vmem:[#allocation7 + $0x2e4] sm:$0xf] }
  0x5f   :  { %1410 = vmatpush.bf16.msra.mxu2 %v3598_v62 }
  0x60   :  { %1423 = vmatpush.bf16.msra.mxu3 %v3630_v4  ;;  %v3613_v4 = vld [vmem:[#allocation7 + $0x124] sm:$0xf] }
  0x61   :  { %984 = vmatpush.bf16.msra.mxu0 %v3530_v38 }
  0x65   :  { %985 = vmatpush.bf16.msra.mxu0 %v3526_v49 }
  0x69   :  { %986 = vmatpush.bf16.msra.mxu0 %v3522_v63 }
  0xb5   :  { %v792_v16 = vpop.f32.mrf.mxu0 }
  0xb6   :  { %v805_v17 = vpop.f32.mrf.mxu1  ;;  %v793_v26 = vadd.f32 %v792_v16, %v398_v23 }
  0xb8   :  { %v806_v30 = vadd.f32 %v805_v17, %v793_v26  ;;  %v3594_v17 = vor.u32 %v3904_v13, %v3593_v10  ;;  %v896_v26 = vmul.f32 %v4227_v39, %v895_v3  ;;  %v3582_v3 = vor.u32 %v3901_v1, %v3581_v0  ;;  %v3549_v10 = vld [vmem:[#allocation7 + $0x24] sm:$0xf] }
  0xb9   :  { %v3693_v1 = vld [vmem:[#allocation7 + $0x264] sm:$0xf] }
  0xba   :  { %1411 = vmatpush.bf16.msra.mxu2 %v3594_v17 }
  0xbd   :  { %v818_v18 = vpop.f32.mrf.mxu2  ;;  %v794_v20 = vpop.f32.mrf.mxu0 }
  0xbe   :  { %v831_v19 = vpop.f32.mrf.mxu3  ;;  %v807_v22 = vpop.f32.mrf.mxu1  ;;  %v819_v35 = vadd.f32 %v818_v18, %v806_v30  ;;  %v3518_v18 = vor.u32 %v3957_v15, %v3517_v14  ;;  %v3912_v20 = vld [vmem:[#allocation7 + $0x158] sm:$0xf0]  ;;  %v3513_v30 = vld [vmem:[#allocation8 + $0x10] sm:$0xf]  ;;  %1412 = vmatpush.bf16.msra.mxu2 %v3590_v32 }
  0xbf   :  { %v3514_v37 = vor.u32 %v3956_v33, %v3513_v30  ;;  %v3900_v14 = vld [vmem:[#allocation7 + $0x98] sm:$0xf0]  ;;  %v3899_v30 = vld [vmem:[#allocation7 + $0x88] sm:$0xf0] }
  0xc0   :  { %v832_v40 = vadd.f32 %v831_v19, %v819_v35  ;;  %v3625_v19 = vld [vmem:[#allocation7 + $0x154] sm:$0xf]  ;;  %987 = vmatpush.bf16.msra.mxu0 %v3518_v18  ;;  %v3911_v35 = vld [vmem:[#allocation7 + $0x148] sm:$0xf0]  ;;  %v3578_v17 = vor.u32 %v3900_v14, %v3577_v12  ;;  %v3938_v32 = vld [vmem:[#allocation7 + $0x2f8] sm:$0xf0] }
  0xc1   :  { %v3626_v22 = vor.u32 %v3912_v20, %v3625_v19  ;;  %v3622_v38 = vor.u32 %v3911_v35, %v3621_v34  ;;  %v3609_v18 = vld [vmem:[#allocation7 + $0x114] sm:$0xf]  ;;  %v3908_v19 = vld [vmem:[#allocation7 + $0x118] sm:$0xf0]  ;;  %v3574_v34 = vor.u32 %v3899_v30, %v3573_v28  ;;  %v3943_v28 = vld [vmem:[#allocation7 + $0x348] sm:$0xf0] }
  0xc2   :  { %1413 = vmatpush.bf16.msra.mxu2 %v3586_v50  ;;  %v3657_v20 = vld [vmem:[#allocation7 + $0x1d4] sm:$0xf]  ;;  %v3944_v12 = vld [vmem:[#allocation7 + $0x358] sm:$0xf0] }
  0xc3   :  { %1424 = vmatpush.bf16.msra.mxu3 %v3626_v22  ;;  %v3610_v22 = vor.u32 %v3908_v19, %v3609_v18  ;;  %v3697_v50 = vld [vmem:[#allocation7 + $0x274] sm:$0xf]  ;;  %v3717_v18 = vld [vmem:[#allocation7 + $0x2c4] sm:$0xf] }
  0xc4   :  { %988 = vmatpush.bf16.msra.mxu0 %v3514_v37  ;;  %v3907_v37 = vld [vmem:[#allocation7 + $0x108] sm:$0xf0] }
  0xc5   :  { %v820_v24 = vpop.f32.mrf.mxu2 }
  0xc6   :  { %v833_v25 = vpop.f32.mrf.mxu3  ;;  %v3561_v24 = vld [vmem:[#allocation7 + $0x54] sm:$0xf]  ;;  %1414 = vmatpush.bf16.msra.mxu2 %v3582_v3 }
  0xc7   :  { %v3896_v25 = vld [vmem:[#allocation7 + $0x58] sm:$0xf0]  ;;  %1425 = vmatpush.bf16.msra.mxu3 %v3622_v38  ;;  %v3721_v3 = vld [vmem:[#allocation7 + $0x2d4] sm:$0xf] }
  0xc8   :  { %v3562_v27 = vor.u32 %v3896_v25, %v3561_v24 }
  0xca   :  { %1398 = vmatpush.bf16.msra.mxu1 %v3562_v27  ;;  %1415 = vmatpush.bf16.msra.mxu2 %v3578_v17  ;;  %v3892_v27 = vld [vmem:[#allocation7 + $0x18] sm:$0xf0] }
  0xcb   :  { %1426 = vmatpush.bf16.msra.mxu3 %v3618_v55  ;;  %v3937_v55 = vld [vmem:[#allocation7 + $0x2e8] sm:$0xf0]  ;;  %v3928_v17 = vld [vmem:[#allocation7 + $0x258] sm:$0xf0] }
  0xcc   :  { %v3726_v57 = vor.u32 %v3937_v55, %v3725_v52  ;;  %v3709_v52 = vld [vmem:[#allocation7 + $0x2a4] sm:$0xf] }
  0xcd   :  { %v3741_v55 = vld [vmem:[#allocation7 + $0x324] sm:$0xf] }
  0xce   :  { %1399 = vmatpush.bf16.msra.mxu1 %v3558_v45  ;;  %1416 = vmatpush.bf16.msra.mxu2 %v3574_v34  ;;  %v3946_v45 = vld [vmem:[#allocation7 + $0x378] sm:$0xf0] }
  0xcf   :  { %v3934_v34 = vld [vmem:[#allocation7 + $0x2b8] sm:$0xf0] }
  0xd5   :  { %v844_v41 = vpop.f32.mrf.mxu0 }
  0xd6   :  { %v857_v44 = vpop.f32.mrf.mxu1  ;;  %v845_v48 = vadd.f32 %v844_v41, %v832_v40 }
  0xd8   :  { %v858_v61 = vadd.f32 %v857_v44, %v845_v48  ;;  %v897_v44 = vadd.f32 %v4227_v39, %v896_v26  ;;  %v3509_v48 = vld [vmem:[#allocation8] sm:$0xf]  ;;  %v3545_v26 = vld [vmem:[#allocation7 + $0x14] sm:$0xf] }
  0xd9   :  { %v3510_v54 = vor.u32 %v3955_v51, %v3509_v48  ;;  %v3546_v29 = vor.u32 %v3892_v27, %v3545_v26  ;;  %v3762_v48 = vor.u32 %v3946_v45, %v3761_v42  ;;  %v3930_v51 = vld [vmem:[#allocation7 + $0x278] sm:$0xf0]  ;;  %v3749_v27 = vld [vmem:[#allocation7 + $0x344] sm:$0xf]  ;;  %v3915_v42 = vld [vmem:[#allocation7 + $0x188] sm:$0xf0] }
  0xda   :  { %v4238_v62 = vsel %vm898_vm0, %v4227_v39, %v897_v44  ;;  %v3745_v45 = vld [vmem:[#allocation7 + $0x334] sm:$0xf] }
  0xdb   :  { %989 = vmatpush.bf16.msra.mxu0 %v3510_v54  ;;  %v3698_v54 = vor.u32 %v3930_v51, %v3697_v50  ;;  %v3681_v50 = vld [vmem:[#allocation7 + $0x234] sm:$0xf]  ;;  %v3926_v51 = vld [vmem:[#allocation7 + $0x238] sm:$0xf0] }
  0xdd   :  { %v870_v2 = vpop.f32.mrf.mxu2  ;;  %v846_v7 = vpop.f32.mrf.mxu0 }
  0xde   :  { %v871_v5 = vadd.f32 %v870_v2, %v858_v61  ;;  %v883_v6 = vpop.f32.mrf.mxu3  ;;  %v859_v11 = vpop.f32.mrf.mxu1  ;;  %v3894_v61 = vld [vmem:[#allocation7 + $0x38] sm:$0xf0] }
  0xdf   :  { %v3554_v63 = vor.u32 %v3894_v61, %v3553_v60  ;;  %1435 = vmatpush.bf16.msrb.mxu0 %v3666_v59  ;;  %v3893_v11 = vld [vmem:[#allocation7 + $0x28] sm:$0xf0]  ;;  %v3757_v59 = vld [vmem:[#allocation7 + $0x364] sm:$0xf] }
  0xe0   :  { %v4230_v16 = vadd.f32 %v883_v6, %v871_v5  ;;  %v3909_v5 = vld [vmem:[#allocation7 + $0x128] sm:$0xf0]  ;;  %v3661_v6 = vld [vmem:[#allocation7 + $0x1e4] sm:$0xf]  ;;  %v3550_v13 = vor.u32 %v3893_v11, %v3549_v10  ;;  %v3753_v11 = vld [vmem:[#allocation7 + $0x354] sm:$0xf] }
  0xe1   :  { %1400 = vmatpush.bf16.msra.mxu1 %v3554_v63  ;;  %v3614_v7 = vor.u32 %v3909_v5, %v3613_v4  ;;  %v3662_v39 = vor.u32 %v3921_v8, %v3661_v6  ;;  %v3945_v60 = vld [vmem:[#allocation7 + $0x368] sm:$0xf0]  ;;  %v3936_v5 = vld [vmem:[#allocation7 + $0x2d8] sm:$0xf0]  ;;  %v3645_v6 = vld [vmem:[#allocation7 + $0x1a4] sm:$0xf]  ;;  %v3754_v14 = vor.u32 %v3944_v12, %v3753_v11 }
  0xe2   :  { %v887_v23 = vrot.slane %v4230_v16, 4  ;;  %v3758_v0 = vor.u32 %v3945_v60, %v3757_v59  ;;  %v3701_v12 = vld [vmem:[#allocation7 + $0x284] sm:$0xf] }
  0xe3   :  { %1427 = vmatpush.bf16.msra.mxu3 %v3614_v7  ;;  %1436 = vmatpush.bf16.msrb.mxu0 %v3662_v39  ;;  %v3917_v7 = vld [vmem:[#allocation7 + $0x1a8] sm:$0xf0]  ;;  %v3722_v39 = vor.u32 %v3936_v5, %v3721_v3  ;;  %v3737_v3 = vld [vmem:[#allocation7 + $0x314] sm:$0xf] }
  0xe4   :  { %v888_v31 = vadd.f32 %v887_v23, %v4230_v16  ;;  %v3920_v23 = vld [vmem:[#allocation7 + $0x1d8] sm:$0xf0]  ;;  %v3646_v10 = vor.u32 %v3917_v7, %v3645_v6 }
  0xe5   :  { %v872_v36 = vpop.f32.mrf.mxu2  ;;  %1401 = vmatpush.bf16.msra.mxu1 %v3550_v13  ;;  %v3658_v25 = vor.u32 %v3920_v23, %v3657_v20  ;;  %v996_v13 = vld [vmem:[#allocation5 + $0x8] sm:$0xff]  ;;  %v3940_v6 = vld [vmem:[#allocation7 + $0x318] sm:$0xf0] }
  0xe6   :  { %v889_v40 = vrot.slane %v888_v31, 2  ;;  %v885_v41 = vpop.f32.mrf.mxu3  ;;  %v3605_v36 = vld [vmem:[#allocation7 + $0x104] sm:$0xf]  ;;  %v1004_v19 = vpack.c.bf16 %v996_v13, %v996_v13  ;;  %v3935_v23 = vld [vmem:[#allocation7 + $0x2c8] sm:$0xf0]  ;;  %v3738_v7 = vor.u32 %v3940_v6, %v3737_v3 }
  0xe7   :  { %1428 = vmatpush.bf16.msra.mxu3 %v3610_v22  ;;  %1437 = vmatpush.bf16.msrb.mxu0 %v3658_v25  ;;  %v3606_v38 = vor.u32 %v3907_v37, %v3605_v36  ;;  %v3919_v41 = vld [vmem:[#allocation7 + $0x1c8] sm:$0xf0]  ;;  %v3916_v25 = vld [vmem:[#allocation7 + $0x198] sm:$0xf0]  ;;  %v3718_v26 = vor.u32 %v3935_v23, %v3717_v18 }
  0xe8   :  { %v890_v49 = vadd.f32 %v889_v40, %v888_v31  ;;  %v3729_v31 = vld [vmem:[#allocation7 + $0x2f4] sm:$0xf]  ;;  %v3653_v40 = vld [vmem:[#allocation7 + $0x1c4] sm:$0xf]  ;;  %1417 = vmatmul.bf16.vlgmr.msra.gmra.mxu2 %v1004_v19  ;;  %v3931_v13 = vld [vmem:[#allocation7 + $0x288] sm:$0xf0] }
  0xe9   :  { %v3730_v35 = vor.u32 %v3938_v32, %v3729_v31  ;;  %1402 = vmatpush.bf16.msra.mxu1 %v3546_v29  ;;  %v3654_v44 = vor.u32 %v3919_v41, %v3653_v40  ;;  %v3685_v29 = vld [vmem:[#allocation7 + $0x244] sm:$0xf]  ;;  %v3927_v32 = vld [vmem:[#allocation7 + $0x248] sm:$0xf0]  ;;  %v997_v40 = vld [vmem:[#allocation5 + $0x10] sm:$0xff] }
  0xea   :  { %v891_v58 = vrot.slane %v890_v49, 1  ;;  %v3686_v37 = vor.u32 %v3927_v32, %v3685_v29  ;;  %v3637_v41 = vld [vmem:[#allocation7 + $0x184] sm:$0xf]  ;;  %v3939_v18 = vld [vmem:[#allocation7 + $0x308] sm:$0xf0] }
  0xeb   :  { %1461 = vmatpush.bf16.msrb.mxu2 %v3730_v35  ;;  %1429 = vmatpush.bf16.msra.mxu3 %v3606_v38  ;;  %v3750_v35 = vor.u32 %v3943_v28, %v3749_v27  ;;  %v1001_v27 = vld [vmem:[#allocation5 + $0x30] sm:$0xff] }
  0xec   :  { %v892_v2 = vadd.f32 %v891_v58, %v890_v49  ;;  %v3542_v49 = vor.u32 %v3891_v47, %v3541_v46  ;;  %1438 = vmatpush.bf16.msrb.mxu0 %v3654_v44  ;;  %v3918_v58 = vld [vmem:[#allocation7 + $0x1b8] sm:$0xf0]  ;;  %v3638_v44 = vor.u32 %v3915_v42, %v3637_v41  ;;  %v1009_v29 = vpack.c.bf16 %v1001_v27, %v1001_v27  ;;  %v3793_v41 = vld [vmem:[#allocation7 + $0x3f4] sm:$0xf]  ;;  %v3965_v27 = vld [vmem:[#allocation8 + $0x28] sm:$0xf0] }
  0xed   :  { %v3650_v63 = vor.u32 %v3918_v58, %v3649_v56  ;;  %v3942_v46 = vld [vmem:[#allocation7 + $0x338] sm:$0xf0]  ;;  %v3941_v56 = vld [vmem:[#allocation7 + $0x328] sm:$0xf0] }
  0xee   :  { %v4241_v9 = vmul.f32 %v4238_v62, %v892_v2  ;;  %1403 = vmatpush.bf16.msra.mxu1 %v3542_v49  ;;  %v3929_v2 = vld [vmem:[#allocation7 + $0x268] sm:$0xf0]  ;;  %v3746_v47 = vor.u32 %v3942_v46, %v3745_v45  ;;  %v3742_v58 = vor.u32 %v3941_v56, %v3741_v55  ;;  %v3954_v42 = vld [vmem:[#allocation7 + $0x3f8] sm:$0xf0]  ;;  %v3789_v46 = vld [vmem:[#allocation7 + $0x3e4] sm:$0xf] }
  0xef   :  { %1474 = vmatpush.bf16.msrb.mxu3 %v3762_v48  ;;  %1462 = vmatpush.bf16.msrb.mxu2 %v3726_v57  ;;  %v3694_v4 = vor.u32 %v3929_v2, %v3693_v1  ;;  %v995_v48 = vld [vmem:[#allocation5] sm:$0xff]  ;;  %v3932_v2 = vld [vmem:[#allocation7 + $0x298] sm:$0xf0] }
  0xf0   :  { %v901_v15 = vsub.f32 %v4230_v16, %v4241_v9  ;;  %1439 = vmatpush.bf16.msrb.mxu0 %v3650_v63  ;;  %v1003_v49 = vpack.c.bf16 %v995_v48, %v995_v48  ;;  %v3925_v63 = vld [vmem:[#allocation7 + $0x228] sm:$0xf0]  ;;  %v3825_v48 = vld [vmem:[#allocation8 + $0x74] sm:$0xf]  ;;  %v3781_v56 = vld [vmem:[#allocation7 + $0x3c4] sm:$0xf] }
  0xf2   :  { %v902_v24 = vmul.f32 %v901_v15, %v901_v15  ;;  %1448 = vmatpush.bf16.msrb.mxu1 %v3698_v54  ;;  %v3689_v15 = vld [vmem:[#allocation7 + $0x254] sm:$0xf]  ;;  %v3933_v54 = vld [vmem:[#allocation7 + $0x2a8] sm:$0xf0] }
  0xf3   :  { %1475 = vmatpush.bf16.msrb.mxu3 %v3758_v0  ;;  %v3690_v22 = vor.u32 %v3928_v17, %v3689_v15  ;;  %1463 = vmatpush.bf16.msrb.mxu2 %v3722_v39  ;;  %v3710_v57 = vor.u32 %v3933_v54, %v3709_v52  ;;  %v3705_v0 = vld [vmem:[#allocation7 + $0x294] sm:$0xf]  ;;  %v3702_v17 = vor.u32 %v3931_v13, %v3701_v12  ;;  %v3969_v52 = vld [vmem:[#allocation8 + $0x68] sm:$0xf0]  ;;  %v3952_v54 = vld [vmem:[#allocation7 + $0x3d8] sm:$0xf0] }
  0xf4   :  { %v903_v33 = vrot.slane %v902_v24, 4  ;;  %1440 = vmatpush.bf16.msrb.mxu0 %v3646_v10  ;;  %1404 = vmatmul.bf16.vlgmr.msra.gmra.mxu1 %v1003_v49  ;;  %v3706_v5 = vor.u32 %v3932_v2, %v3705_v0  ;;  %v3673_v39 = vld [vmem:[#allocation7 + $0x214] sm:$0xf]  ;;  %v3924_v10 = vld [vmem:[#allocation7 + $0x218] sm:$0xf0] }
  0xf5   :  { %v3674_v11 = vor.u32 %v3924_v10, %v3673_v39  ;;  %v3821_v49 = vld [vmem:[#allocation8 + $0x64] sm:$0xf]  ;;  %v3949_v2 = vld [vmem:[#allocation7 + $0x3a8] sm:$0xf0]  ;;  %v1002_v10 = vld [vmem:[#allocation5 + $0x38] sm:$0xff] }
  0xf6   :  { %v904_v43 = vadd.f32 %v903_v33, %v902_v24  ;;  %1449 = vmatpush.bf16.msrb.mxu1 %v3694_v4  ;;  %v3641_v24 = vld [vmem:[#allocation7 + $0x194] sm:$0xf]  ;;  %v3968_v13 = vld [vmem:[#allocation8 + $0x58] sm:$0xf0] }
  0xf7   :  { %v3642_v31 = vor.u32 %v3916_v25, %v3641_v24  ;;  %v3713_v33 = vld [vmem:[#allocation7 + $0x2b4] sm:$0xf]  ;;  %1476 = vmatpush.bf16.msrb.mxu3 %v3754_v14  ;;  %1464 = vmatpush.bf16.msrb.mxu2 %v3718_v26  ;;  %v3733_v14 = vld [vmem:[#allocation7 + $0x304] sm:$0xf]  ;;  %v3923_v25 = vld [vmem:[#allocation7 + $0x208] sm:$0xf0] }
  0xf8   :  { %v905_v53 = vrot.slane %v904_v43, 2  ;;  %v3714_v38 = vor.u32 %v3934_v34, %v3713_v33  ;;  %v3734_v19 = vor.u32 %v3939_v18, %v3733_v14  ;;  %v3669_v24 = vld [vmem:[#allocation7 + $0x204] sm:$0xf]  ;;  %v3817_v12 = vld [vmem:[#allocation8 + $0x54] sm:$0xf] }
  0xf9   :  { %1441 = vmatpush.bf16.msrb.mxu0 %v3642_v31  ;;  %v3670_v26 = vor.u32 %v3923_v25, %v3669_v24  ;;  %v999_v31 = vld [vmem:[#allocation5 + $0x20] sm:$0xff]  ;;  %v3818_v14 = vor.u32 %v3968_v13, %v3817_v12 }
  0xfa   :  { %v906_v61 = vadd.f32 %v905_v53, %v904_v43  ;;  %1450 = vmatpush.bf16.msrb.mxu1 %v3690_v22  ;;  %v1005_v43 = vpack.c.bf16 %v997_v40, %v997_v40  ;;  %v3682_v53 = vor.u32 %v3926_v51, %v3681_v50  ;;  %v1007_v32 = vpack.c.bf16 %v999_v31, %v999_v31  ;;  %v3801_v31 = vld [vmem:[#allocation8 + $0x14] sm:$0xf] }
  0xfb   :  { %1477 = vmatpush.bf16.msrb.mxu3 %v3750_v35  ;;  %1465 = vmatpush.bf16.msrb.mxu2 %v3714_v38 }
  0xfc   :  { %v907_v8 = vrot.slane %v906_v61, 1  ;;  %1430 = vmatmul.bf16.vlgmr.msra.gmra.mxu3 %v1005_v43 }
  0xfd   :  { %1442 = vmatpush.bf16.msrb.mxu0 %v3638_v44  ;;  %v3794_v44 = vor.u32 %v3954_v42, %v3793_v41 }
  0xfe   :  { %v908_v20 = vadd.f32 %v907_v8, %v906_v61  ;;  %1451 = vmatpush.bf16.msrb.mxu1 %v3686_v37  ;;  %v3677_v61 = vld [vmem:[#allocation7 + $0x224] sm:$0xf] }
  0xff   :  { %1478 = vmatpush.bf16.msrb.mxu3 %v3746_v47  ;;  %1466 = vmatpush.bf16.msrb.mxu2 %v3710_v57  ;;  %v3678_v1 = vor.u32 %v3925_v63, %v3677_v61  ;;  %v3953_v47 = vld [vmem:[#allocation7 + $0x3e8] sm:$0xf0]  ;;  %v3950_v61 = vld [vmem:[#allocation7 + $0x3b8] sm:$0xf0] }
 0x100   :  { %v909_v30 = vmul.f32 %v908_v20, %v4238_v62  ;;  %v1000_v20 = vld [vmem:[#allocation5 + $0x28] sm:$0xff]  ;;  %v3790_v50 = vor.u32 %v3953_v47, %v3789_v46 }
 0x101   :  { %v1008_v23 = vpack.c.bf16 %v1000_v20, %v1000_v20  ;;  %v3951_v57 = vld [vmem:[#allocation7 + $0x3c8] sm:$0xf0] }
 0x102   :  { %v4246_v36 = vadd.f32 1e-05, %v909_v30  ;;  %1452 = vmatpush.bf16.msrb.mxu1 %v3682_v53  ;;  %v3785_v53 = vld [vmem:[#allocation7 + $0x3d4] sm:$0xf] }
 0x103   :  { %1479 = vmatpush.bf16.msrb.mxu3 %v3742_v58  ;;  %1467 = vmatpush.bf16.msrb.mxu2 %v3706_v5  ;;  %v3786_v55 = vor.u32 %v3952_v54, %v3785_v53  ;;  %v3782_v58 = vor.u32 %v3951_v57, %v3781_v56  ;;  %v3948_v5 = vld [vmem:[#allocation7 + $0x398] sm:$0xf0] }
 0x104   :  { %4009 = vrsqrt.f32 %v4246_v36  ;;  %vm917_vm2 = vweird.f32 %v4246_v36 }
 0x106   :  { %1453 = vmatpush.bf16.msrb.mxu1 %v3678_v1  ;;  %v3773_v1 = vld [vmem:[#allocation7 + $0x3a4] sm:$0xf] }
 0x107   :  { %1480 = vmatpush.bf16.msrb.mxu3 %v3738_v7  ;;  %1468 = vmatpush.bf16.msrb.mxu2 %v3702_v17  ;;  %v3774_v3 = vor.u32 %v3949_v2, %v3773_v1  ;;  %v3765_v7 = vld [vmem:[#allocation7 + $0x384] sm:$0xf]  ;;  %v3967_v17 = vld [vmem:[#allocation8 + $0x48] sm:$0xf0] }
 0x10a   :  { %v4010_v59 = vpop.eup %4009  ;;  %1454 = vmatpush.bf16.msrb.mxu1 %v3674_v11  ;;  %1469 = vmatmul.bf16.vlgmr.msrb.gmra.mxu2 %v1008_v23  ;;  %v1010_v11 = vpack.c.bf16 %v1002_v10, %v1002_v10  ;;  %v3966_v23 = vld [vmem:[#allocation8 + $0x38] sm:$0xf0] }
 0x10b   :  { %v912_v60 = vmul.f32 %v4010_v59, %v4246_v36  ;;  %vm918_vm1 = vweird.f32 %v4010_v59  ;;  %1481 = vmatpush.bf16.msrb.mxu3 %v3734_v19 }
 0x10c   :  { %vm919_vm3 = vmor %vm917_vm2, %vm918_vm1 }
 0x10d   :  { %v913_v4 = vmul.f32 %v4010_v59, %v912_v60  ;;  %v3777_v60 = vld [vmem:[#allocation7 + $0x3b4] sm:$0xf] }
 0x10e   :  { %1455 = vmatpush.bf16.msrb.mxu1 %v3670_v26  ;;  %1482 = vmatmul.bf16.vlgmr.msrb.gmra.mxu3 %v1009_v29  ;;  %v3778_v0 = vor.u32 %v3950_v61, %v3777_v60  ;;  %v3805_v26 = vld [vmem:[#allocation8 + $0x24] sm:$0xf] }
 0x10f   :  { %v914_v8 = vmul.f32 0.5, %v913_v4  ;;  %v3769_v4 = vld [vmem:[#allocation7 + $0x394] sm:$0xf] }
 0x110   :  { %v3770_v6 = vor.u32 %v3948_v5, %v3769_v4 }
 0x111   :  { %v915_v15 = vsub.f32 1.5, %v914_v8  ;;  %1456 = vmatmul.bf16.vlgmr.msrb.gmra.mxu1 %v1007_v32  ;;  %v3947_v8 = vld [vmem:[#allocation7 + $0x388] sm:$0xf0]  ;;  %v3964_v32 = vld [vmem:[#allocation8 + $0x18] sm:$0xf0] }
 0x112   :  { %v3766_v39 = vor.u32 %v3947_v8, %v3765_v7 }
 0x113   :  { %v916_v22 = vmul.f32 %v4010_v59, %v915_v15  ;;  %v3813_v15 = vld [vmem:[#allocation8 + $0x44] sm:$0xf] }
 0x114   :  { %v3814_v19 = vor.u32 %v3967_v17, %v3813_v15 }
 0x115   :  { %v920_v28 = vsel %vm919_vm3, %v4010_v59, %v916_v22  ;;  %v998_v59 = vld [vmem:[#allocation5 + $0x18] sm:$0xff]  ;;  %v3809_v22 = vld [vmem:[#allocation8 + $0x34] sm:$0xf] }
 0x116   :  { %v921_v30 = vmul.f32 %v920_v28, %v4224_v21  ;;  %v1006_v63 = vpack.c.bf16 %v998_v59, %v998_v59  ;;  %v3810_v25 = vor.u32 %v3966_v23, %v3809_v22  ;;  %v3806_v28 = vor.u32 %v3965_v27, %v3805_v26 }
 0x118   :  { %v922_v33 = vmul.f32 %v921_v30, %v4241_v9  ;;  %v927_v34 = vperm.slane %v921_v30, 1  ;;  %v3970_v9 = vld [vmem:[#allocation8 + $0x78] sm:$0xf0] }
 0x119   :  { %v3826_v51 = vor.u32 %v3970_v9, %v3825_v48  ;;  %v1011_v9 = vperm.slane %v4224_v21, 4 }
 0x11a   :  { %v924_v35 = vrot.slane %v922_v33, 7  ;;  %v928_v37 = vmul.f32 %v927_v34, %v4230_v16  ;;  %v3822_v16 = vor.u32 %v3969_v52, %v3821_v49  ;;  %v3802_v34 = vor.u32 %v3964_v32, %v3801_v31 }
 0x11b   :  { %1588 = vmatpush.bf16.msra.mxu1 %v3826_v51 }
 0x11c   :  { %v926_v36 = vsub.f32 %v4224_v21, %v924_v35  ;;  %v3797_v35 = vld [vmem:[#allocation8 + $0x4] sm:$0xf] }
 0x11e   :  { %v929_v38 = vperm.slane %v926_v36, 2  ;;  %v3963_v36 = vld [vmem:[#allocation8 + $0x8] sm:$0xf0] }
 0x11f   :  { %1589 = vmatpush.bf16.msra.mxu1 %v3822_v16 }
 0x120   :  { %v930_v40 = vadd.f32 %v929_v38, %v928_v37  ;;  %v3798_v38 = vor.u32 %v3963_v36, %v3797_v35 }
 0x122   :  { %v931_v43 = vmax.f32 %v930_v40, 0.0 }
 0x123   :  { %1590 = vmatpush.bf16.msra.mxu1 %v3818_v14 }
 0x124   :  { %v932_v45 = vpack.c.bf16 %v931_v43, %v931_v43  ;;  %v933_v43 = vperm.slane %v4224_v21, 3 }
 0x126   :  { %990 = vmatmul.bf16.vlgmr.msra.gmra.mxu0 %v932_v45 }
 0x127   :  { %1487 = vmatpush.bf16.msra.mxu0 %v3794_v44  ;;  %1591 = vmatpush.bf16.msra.mxu1 %v3814_v19 }
 0x12b   :  { %1488 = vmatpush.bf16.msra.mxu0 %v3790_v50  ;;  %1592 = vmatpush.bf16.msra.mxu1 %v3810_v25 }
 0x12f   :  { %1489 = vmatpush.bf16.msra.mxu0 %v3786_v55  ;;  %1593 = vmatpush.bf16.msra.mxu1 %v3806_v28 }
 0x133   :  { %1490 = vmatpush.bf16.msra.mxu0 %v3782_v58  ;;  %1594 = vmatpush.bf16.msra.mxu1 %v3802_v34 }
 0x136   :  { %1443 = vmatmul.bf16.vlgmr.msrb.gmra.mxu0 %v1006_v63 }
 0x137   :  { %1491 = vmatpush.bf16.msra.mxu0 %v3778_v0  ;;  %1595 = vmatpush.bf16.msra.mxu1 %v3798_v38 }
 0x13b   :  { %1492 = vmatpush.bf16.msra.mxu0 %v3774_v3 }
 0x13f   :  { %1493 = vmatpush.bf16.msra.mxu0 %v3770_v6 }
 0x143   :  { %1494 = vmatpush.bf16.msra.mxu0 %v3766_v39 }
 0x146   :  { %1495 = vmatmul.bf16.vlgmr.msra.gmra.mxu0 %v1010_v11 }
 0x16b   :  { %v1418_v20 = vpop.f32.mrf.mxu2 }
 0x171   :  { %v1405_v18 = vpop.f32.mrf.mxu1 }
 0x172   :  { %v1406_v51 = vadd.f32 %v1405_v18, %v1011_v9 }
 0x173   :  { %v1420_v30 = vpop.f32.mrf.mxu2 }
 0x174   :  { %v1419_v54 = vadd.f32 %v1418_v20, %v1406_v51 }
 0x179   :  { %v1407_v29 = vpop.f32.mrf.mxu1 }
 0x17f   :  { %v1431_v24 = vpop.f32.mrf.mxu3 }
 0x180   :  { %v1432_v56 = vadd.f32 %v1431_v24, %v1419_v54 }
 0x187   :  { %v1433_v33 = vpop.f32.mrf.mxu3 }
 0x18d   :  { %v1470_v40 = vpop.f32.mrf.mxu2 }
 0x18e   :  { %v1457_v37 = vpop.f32.mrf.mxu1 }
 0x191   :  { %v1483_v41 = vpop.f32.mrf.mxu3 }
 0x195   :  { %v1472_v44 = vpop.f32.mrf.mxu2 }
 0x196   :  { %v1459_v42 = vpop.f32.mrf.mxu1 }
 0x199   :  { %v1485_v46 = vpop.f32.mrf.mxu3 }
 0x1a3   :  { %v991_v45 = vpop.f32.mrf.mxu0 }
 0x1a4   :  { %v4256_v47 = vadd.f32 %v991_v45, %v933_v43 }
 0x1a6   :  { %v1621_v48 = vrot.slane %v4256_v47, 4 }
 0x1a8   :  { %v1622_v49 = vadd.f32 %v1621_v48, %v4256_v47  ;;  %v4174_v48 = vmov 7.0  }
 0x1aa   :  { %v1623_v50 = vrot.slane %v1622_v49, 2 }
 0x1ab   :  { %v993_v52 = vpop.f32.mrf.mxu0 }
 0x1ac   :  { %v1624_v53 = vadd.f32 %v1623_v50, %v1622_v49 }
 0x1ae   :  { %v1625_v16 = vrot.slane %v1624_v53, 1 }
 0x1b0   :  { %v1626_v55 = vadd.f32 %v1625_v16, %v1624_v53 }
 0x1b2   :  { %v1627_v57 = vmul.f32 %v1626_v55, %v4238_v62 }
 0x1b3   :  { %v1444_v58 = vpop.f32.mrf.mxu0 }
 0x1b4   :  { %v1635_v59 = vsub.f32 %v4256_v47, %v1627_v57  ;;  %v1445_v60 = vadd.f32 %v1444_v58, %v1432_v56 }
 0x1b6   :  { %1730 = vxpose.xlu0.b32.start.end [1/1] (short) %v1635_v59, 128  ;;  %v4263_v61 = vand.u32 4294901760, %v1635_v59  ;;  %v1458_v0 = vadd.f32 %v1457_v37, %v1445_v60  ;;  %v1637_v9 = vmul.f32 %v1635_v59, %v1635_v59 }
 0x1b8   :  { %1827 = vmatpush.msra.mxu2 %v4263_v61  ;;  %2158 = vmatpush.msrb.mxu1 %v4263_v61  ;;  %v4268_v63 = vsub.f32 %v1635_v59, %v4263_v61  ;;  %v1471_v4 = vadd.f32 %v1470_v40, %v1458_v0  ;;  %v1638_v49 = vrot.slane %v1637_v9, 4 }
 0x1ba   :  { %2060 = vmatpush.msrb.mxu0 %v4268_v63  ;;  %3971 = vmatpush.msrb.mxu2 %v4268_v63  ;;  %v1974_v1 = vand.u32 4294901760, %v4268_v63  ;;  %v1484_v6 = vadd.f32 %v1483_v41, %v1471_v4  ;;  %v1639_v51 = vadd.f32 %v1638_v49, %v1637_v9 }
 0x1bb   :  { %v1446_v2 = vpop.f32.mrf.mxu0 }
 0x1bc   :  { %v1975_v3 = vsub.f32 %v4268_v63, %v1974_v1  ;;  %v1640_v53 = vrot.slane %v1639_v51, 2 }
 0x1be   :  { %v1976_v5 = vand.u32 4294901760, %v1975_v3  ;;  %v1641_v16 = vadd.f32 %v1640_v53, %v1639_v51 }
 0x1c0   :  { %1977 = vmatpush.msra.mxu3 %v1976_v5  ;;  %v1642_v56 = vrot.slane %v1641_v16, 1 }
 0x1c2   :  { %3972 = vmatpush.msrb.mxu3 %v4263_v61  ;;  %v4281_v58 = vadd.f32 %v1642_v56, %v1641_v16 }
 0x1c3   :  { %v1496_v7 = vpop.f32.mrf.mxu0 }
 0x1c4   :  { %v1497_v8 = vadd.f32 %v1496_v7, %v1484_v6 }
 0x1c6   :  { %v1500_v39 = vrot.slane %v1497_v8, 4 }
 0x1c8   :  { %v1501_v10 = vadd.f32 %v1500_v39, %v1497_v8 }
 0x1ca   :  { %v1502_v11 = vrot.slane %v1501_v10, 2 }
 0x1cb   :  { %v1498_v12 = vpop.f32.mrf.mxu0 }
 0x1cc   :  { %v1503_v13 = vadd.f32 %v1502_v11, %v1501_v10 }
 0x1ce   :  { %v1504_v14 = vrot.slane %v1503_v13, 1 }
 0x1d0   :  { %v1505_v15 = vadd.f32 %v1504_v14, %v1503_v13 }
 0x1d2   :  { %v1506_v17 = vmul.f32 %v1505_v15, %v4238_v62 }
 0x1d4   :  { %v1507_v18 = vsub.f32 %v1497_v8, %v1506_v17 }
 0x1d6   :  { %v1508_v19 = vmul.f32 %v1507_v18, %v1507_v18 }
 0x1d8   :  { %v1509_v20 = vrot.slane %v1508_v19, 4 }
 0x1da   :  { %v1510_v22 = vadd.f32 %v1509_v20, %v1508_v19 }
 0x1dc   :  { %v1511_v23 = vrot.slane %v1510_v22, 2 }
 0x1de   :  { %v1512_v24 = vadd.f32 %v1511_v23, %v1510_v22 }
 0x1e0   :  { %v1513_v25 = vrot.slane %v1512_v24, 1 }
 0x1e2   :  { %v1514_v26 = vadd.f32 %v1513_v25, %v1512_v24 }
 0x1e4   :  { %v1515_v27 = vmul.f32 %v1514_v26, %v4238_v62 }
 0x1e6   :  { %v1516_v28 = vadd.f32 1e-05, %v1515_v27 }
 0x1e8   :  { %4011 = vrsqrt.f32 %v1516_v28  ;;  %vm1523_vm5 = vweird.f32 %v1516_v28 }
 0x1e9   :  { %4013 = vrcp.f32 %v4174_v48 }
 0x1ee   :  { %v4012_v29 = vpop.eup %4011 }
 0x1ef   :  { %v1518_v30 = vmul.f32 %v4012_v29, %v1516_v28  ;;  %vm1524_vm4 = vweird.f32 %v4012_v29  ;;  %v4014_v50 = vpop.eup %4013 }
 0x1f0   :  { %vm1525_vm6 = vmor %vm1523_vm5, %vm1524_vm4  ;;  %v1652_v52 = vmul.f32 7.0, %v4014_v50  ;;  %vm1656_vm8 = vweird.f32 %v4014_v50 }
 0x1f1   :  { %v1519_v31 = vmul.f32 %v4012_v29, %v1518_v30 }
 0x1f2   :  { %v1653_v54 = vsub.f32 1.0, %v1652_v52 }
 0x1f3   :  { %v1520_v32 = vmul.f32 0.5, %v1519_v31 }
 0x1f4   :  { %v1654_v55 = vmul.f32 %v4014_v50, %v1653_v54 }
 0x1f5   :  { %v1521_v33 = vsub.f32 1.5, %v1520_v32 }
 0x1f6   :  { %v1655_v57 = vadd.f32 %v4014_v50, %v1654_v55 }
 0x1f7   :  { %v1522_v34 = vmul.f32 %v4012_v29, %v1521_v33 }
 0x1f8   :  { %v4284_v0 = vsel %vm1656_vm8, %v4014_v50, %v1655_v57 }
 0x1f9   :  { %v1526_v35 = vsel %vm1525_vm6, %v4012_v29, %v1522_v34  ;;  %v1658_v3 = vmul.f32 %v4284_v0, %v4281_v58 }
 0x1fa   :  { %v1527_v36 = vmul.f32 %v1526_v35, %v4224_v21 }
 0x1fb   :  { %v4293_v7 = vadd.f32 0.0001, %v1658_v3 }
 0x1fc   :  { %v1528_v37 = vmul.f32 %v1527_v36, %v1506_v17  ;;  %v1533_v38 = vperm.slane %v1527_v36, 5 }
 0x1fd   :  { %4015 = vrsqrt.f32 %v4293_v7  ;;  %vm1667_vm9 = vcmp.eq.f32.partialorder %v4293_v7, inf  ;;  %v1670_v53 = vand.u32 2147483648, %v4293_v7  ;;  %vm1669_vm10 = vcmp.eq.f32.partialorder %v4293_v7, 0.0 }
 0x1fe   :  { %v1530_v40 = vrot.slane %v1528_v37, 7  ;;  %v1534_v42 = vmul.f32 %v1533_v38, %v1497_v8 }
 0x200   :  { %v1532_v41 = vsub.f32 %v4224_v21, %v1530_v40 }
 0x202   :  { %v1535_v43 = vperm.slane %v1532_v41, 6 }
 0x203   :  { %v4016_v18 = vpop.eup %4015 }
 0x204   :  { %v1536_v44 = vadd.f32 %v1535_v43, %v1534_v42 }
 0x206   :  { %v1537_v45 = vmax.f32 %v1536_v44, 0.0 }
 0x208   :  { %v1538_v46 = vpack.c.bf16 %v1537_v45, %v1537_v45  ;;  %v4025_v45 = vld [vmem:[#allocation10] sm:$0xff] }
 0x20a   :  { %1596 = vmatmul.bf16.vlgmr.msra.gmra.mxu1 %v1538_v46  ;;  %v1539_v46 = vperm.slane %v4025_v45, 7 }
 0x25a   :  { %v1746_v21 = vpop.trf.xlu0 }
 0x25b   :  { %v1764_v60 = vsel %vm1762_vm7, %v1746_v21, 0 }
 0x25c   :  { %v4286_v59 = vand.u32 4294901760, %v1764_v60 }
 0x25e   :  { %v1829_v2 = vsub.f32 %v1764_v60, %v4286_v59  ;;  %1979 = vmatmul.f32.vlgmr.msra.gmra.mxu3 %v4286_v59 }
 0x25f   :  { %2356 = vmatpush.msra.mxu3 %v4263_v61 }
 0x260   :  { %v1830_v4 = vand.u32 4294901760, %v1829_v2  ;;  %2063 = vmatmul.f32.vlgmr.msrb.gmra.mxu0 %v1829_v2 }
 0x262   :  { %v1831_v5 = vsub.f32 %v1829_v2, %v1830_v4  ;;  %v1747_v6 = vpop.trf.xlu0  ;;  %2162 = vmatmul.f32.vlgmr.msrb.gmra.mxu1 %v1830_v4 }
 0x263   :  { %v1767_v8 = vsel %vm1762_vm7, %v1747_v6, 0 }
 0x264   :  { %v1832_v39 = vand.u32 4294901760, %v1831_v5  ;;  %v4296_v10 = vand.u32 4294901760, %v1767_v8 }
 0x266   :  { %v1837_v11 = vsub.f32 %v1767_v8, %v4296_v10  ;;  %1833 = vmatmul.f32.vlgmr.msra.gmra.mxu2 %v1832_v39  ;;  %1983 = vmatmul.f32.gmra.mxu3 %v4296_v10 }
 0x267   :  { %2274 = vmatpush.msra.mxu2 %v1974_v1  ;;  %v1661_v1 = vmul.f32 %v4016_v18, %v4293_v7 }
 0x268   :  { %v1838_v61 = vand.u32 4294901760, %v1837_v11  ;;  %2068 = vmatmul.f32.gmra.mxu0 %v1837_v11 }
 0x269   :  { %v1662_v26 = vmul.f32 %v4016_v18, %v1661_v1 }
 0x26a   :  { %v1748_v12 = vpop.trf.xlu0  ;;  %v1839_v13 = vsub.f32 %v1837_v11, %v1838_v61  ;;  %2168 = vmatmul.f32.gmra.mxu1 %v1838_v61 }
 0x26b   :  { %v1770_v14 = vsel %vm1762_vm7, %v1748_v12, 0  ;;  %v1663_v29 = vmul.f32 0.5, %v1662_v26 }
 0x26c   :  { %v4304_v15 = vand.u32 4294901760, %v1770_v14  ;;  %v1840_v17 = vand.u32 4294901760, %v1839_v13 }
 0x26d   :  { %v1664_v35 = vsub.f32 1.5, %v1663_v29 }
 0x26e   :  { %v1845_v19 = vsub.f32 %v1770_v14, %v4304_v15  ;;  %1841 = vmatmul.f32.gmra.mxu2 %v1840_v17  ;;  %1987 = vmatmul.f32.gmra.mxu3 %v4304_v15 }
 0x26f   :  { %v1665_v38 = vmul.f32 %v4016_v18, %v1664_v35 }
 0x270   :  { %v1846_v63 = vand.u32 4294901760, %v1845_v19  ;;  %2073 = vmatmul.f32.gmra.mxu0 %v1845_v19 }
 0x271   :  { %v1666_v48 = vmul.f32 %v1665_v38, %v4293_v7 }
 0x272   :  { %v1749_v20 = vpop.trf.xlu0  ;;  %v1847_v22 = vsub.f32 %v1845_v19, %v1846_v63  ;;  %2174 = vmatmul.f32.gmra.mxu1 %v1846_v63 }
 0x273   :  { %v1773_v23 = vsel %vm1762_vm7, %v1749_v20, 0  ;;  %v1668_v52 = vsel %vm1667_vm9, %v4293_v7, %v1666_v48 }
 0x274   :  { %v4310_v24 = vand.u32 4294901760, %v1773_v23  ;;  %v1848_v25 = vand.u32 4294901760, %v1847_v22  ;;  %v1671_v21 = vsel %vm1669_vm10, %v1670_v53, %v1668_v52 }
 0x275   :  { %v1686_v8 = vsub.f32 1.0, %v1671_v21 }
 0x276   :  { %v1853_v27 = vsub.f32 %v1773_v23, %v4310_v24  ;;  %1849 = vmatmul.f32.gmra.mxu2 %v1848_v25  ;;  %1991 = vmatmul.f32.gmra.mxu3 %v4310_v24 }
 0x277   :  { %v1687_v12 = vmax.f32 %v1686_v8, 0.0 }
 0x278   :  { %v1854_v28 = vand.u32 4294901760, %v1853_v27  ;;  %2078 = vmatmul.f32.gmra.mxu0 %v1853_v27 }
 0x279   :  { %v1689_v1 = vsel %vm1688_vm11, %v1687_v12, 0.0 }
 0x27a   :  { %v1750_v30 = vpop.trf.xlu0  ;;  %v1855_v31 = vsub.f32 %v1853_v27, %v1854_v28  ;;  %2180 = vmatmul.f32.gmra.mxu1 %v1854_v28  ;;  %v3153_v28 = vmul.f32 %v4281_v58, %v4281_v58 }
 0x27b   :  { %v1776_v32 = vsel %vm1762_vm7, %v1750_v30, 0 }
 0x27c   :  { %v4315_v33 = vand.u32 4294901760, %v1776_v32  ;;  %v1856_v34 = vand.u32 4294901760, %v1855_v31  ;;  %v3154_v58 = vsel %vm1688_vm11, %v3153_v28, 0.0 }
 0x27e   :  { %v1861_v36 = vsub.f32 %v1776_v32, %v4315_v33  ;;  %1857 = vmatmul.f32.gmra.mxu2 %v1856_v34  ;;  %1995 = vmatmul.f32.gmra.mxu3 %v4315_v33 }
 0x280   :  { %v1862_v37 = vand.u32 4294901760, %v1861_v36  ;;  %2083 = vmatmul.f32.gmra.mxu0 %v1861_v36 }
 0x282   :  { %v1751_v40 = vpop.trf.xlu0  ;;  %v1863_v41 = vsub.f32 %v1861_v36, %v1862_v37  ;;  %2186 = vmatmul.f32.gmra.mxu1 %v1862_v37 }
 0x283   :  { %v1779_v42 = vsel %vm1762_vm7, %v1751_v40, 0 }
 0x284   :  { %v4320_v43 = vand.u32 4294901760, %v1779_v42  ;;  %v1864_v44 = vand.u32 4294901760, %v1863_v41 }
 0x286   :  { %v1869_v9 = vsub.f32 %v1779_v42, %v4320_v43  ;;  %1865 = vmatmul.f32.gmra.mxu2 %v1864_v44  ;;  %1999 = vmatmul.f32.gmra.mxu3 %v4320_v43 }
 0x287   :  { %v1597_v49 = vpop.f32.mrf.mxu1 }
 0x288   :  { %v1598_v50 = vadd.f32 %v1597_v49, %v1539_v46  ;;  %v1870_v51 = vand.u32 4294901760, %v1869_v9  ;;  %2088 = vmatmul.f32.gmra.mxu0 %v1869_v9 }
 0x28a   :  { %v1628_v54 = vrot.slane %v1598_v50, 4  ;;  %v1752_v16 = vpop.trf.xlu0  ;;  %v1871_v55 = vsub.f32 %v1869_v9, %v1870_v51  ;;  %v1601_v56 = vsub.f32 %v4256_v47, %v1598_v50  ;;  %2192 = vmatmul.f32.gmra.mxu1 %v1870_v51 }
 0x28b   :  { %v1782_v57 = vsel %vm1762_vm7, %v1752_v16, 0 }
 0x28c   :  { %v1629_v60 = vadd.f32 %v1628_v54, %v1598_v50  ;;  %v4331_v2 = vand.u32 4294901760, %v1782_v57  ;;  %v1872_v3 = vand.u32 4294901760, %v1871_v55  ;;  %v1602_v4 = vmul.f32 %v1601_v56, %v1601_v56 }
 0x28e   :  { %v1630_v5 = vrot.slane %v1629_v60, 2  ;;  %v1877_v6 = vsub.f32 %v1782_v57, %v4331_v2  ;;  %1873 = vmatmul.f32.gmra.mxu2 %v1872_v3  ;;  %2003 = vmatmul.f32.gmra.mxu3 %v4331_v2 }
 0x28f   :  { %1603 = vadd.xlane.f32.xlu1 %v1602_v4  ;;  %v1599_v47 = vpop.f32.mrf.mxu1 }
 0x290   :  { %v1631_v39 = vadd.f32 %v1630_v5, %v1629_v60  ;;  %v1878_v7 = vand.u32 4294901760, %v1877_v6  ;;  %2093 = vmatmul.f32.gmra.mxu0 %v1877_v6 }
 0x292   :  { %v1753_v11 = vpop.trf.xlu0  ;;  %v1879_v61 = vsub.f32 %v1877_v6, %v1878_v7  ;;  %v1632_v13 = vrot.slane %v1631_v39, 1  ;;  %2198 = vmatmul.f32.gmra.mxu1 %v1878_v7 }
 0x293   :  { %v1785_v14 = vsel %vm1762_vm7, %v1753_v11, 0 }
 0x294   :  { %v4336_v17 = vand.u32 4294901760, %v1785_v14  ;;  %v1880_v18 = vand.u32 4294901760, %v1879_v61  ;;  %v1633_v19 = vadd.f32 %v1632_v13, %v1631_v39 }
 0x296   :  { %v1885_v63 = vsub.f32 %v1785_v14, %v4336_v17  ;;  %1881 = vmatmul.f32.gmra.mxu2 %v1880_v18  ;;  %2007 = vmatmul.f32.gmra.mxu3 %v4336_v17  ;;  %v1634_v20 = vmul.f32 %v1633_v19, %v4238_v62 }
 0x297   :  { %1690 = vadd.xlane.f32.xlu1 %v1689_v1 }
 0x298   :  { %v1636_v22 = vsub.f32 %v1598_v50, %v1634_v20  ;;  %v1886_v23 = vand.u32 4294901760, %v1885_v63  ;;  %2098 = vmatmul.f32.gmra.mxu0 %v1885_v63 }
 0x29a   :  { %2422 = vxpose.xlu0.b32.start.end [1/1] (short) %v1636_v22, 128  ;;  %v1754_v25 = vpop.trf.xlu0  ;;  %v4342_v26 = vand.u32 4294901760, %v1636_v22  ;;  %v1887_v27 = vsub.f32 %v1885_v63, %v1886_v23  ;;  %v1644_v29 = vmul.f32 %v1636_v22, %v1636_v22  ;;  %2204 = vmatmul.f32.gmra.mxu1 %v1886_v23 }
 0x29b   :  { %v1788_v30 = vsel %vm1762_vm7, %v1754_v25, 0 }
 0x29c   :  { %v4347_v31 = vand.u32 4294901760, %v1788_v30  ;;  %2518 = vmatpush.msra.mxu0 %v4342_v26  ;;  %v1888_v62 = vand.u32 4294901760, %v1887_v27  ;;  %v4351_v32 = vsub.f32 %v1636_v22, %v4342_v26  ;;  %v1645_v34 = vrot.slane %v1644_v29, 4 }
 0x29e   :  { %v1893_v35 = vsub.f32 %v1788_v30, %v4347_v31  ;;  %1889 = vmatmul.f32.gmra.mxu2 %v1888_v62  ;;  %2011 = vmatmul.f32.gmra.mxu3 %v4347_v31  ;;  %v2665_v36 = vand.u32 4294901760, %v4351_v32  ;;  %v1646_v37 = vadd.f32 %v1645_v34, %v1644_v29 }
 0x29f   :  { %3155 = vadd.xlane.f32.xlu1 %v3154_v58 }
 0x2a0   :  { %2965 = vmatpush.msrb.mxu0 %v2665_v36  ;;  %v2666_v38 = vsub.f32 %v4351_v32, %v2665_v36  ;;  %v1894_v40 = vand.u32 4294901760, %v1893_v35  ;;  %v1647_v41 = vrot.slane %v1646_v37, 2 }
 0x2a1   :  { %2103 = vmatmul.f32.gmra.mxu0 %v1893_v35 }
 0x2a2   :  { %v1755_v42 = vpop.trf.xlu0  ;;  %v2667_v44 = vand.u32 4294901760, %v2666_v38  ;;  %v1895_v45 = vsub.f32 %v1893_v35, %v1894_v40  ;;  %v1648_v46 = vadd.f32 %v1647_v41, %v1646_v37  ;;  %2210 = vmatmul.f32.gmra.mxu1 %v1894_v40 }
 0x2a3   :  { %v1791_v48 = vsel %vm1762_vm7, %v1755_v42, 0 }
 0x2a4   :  { %v4359_v9 = vand.u32 4294901760, %v1791_v48  ;;  %2668 = vmatpush.msra.mxu1 %v2667_v44  ;;  %v1896_v49 = vand.u32 4294901760, %v1895_v45  ;;  %v1649_v50 = vrot.slane %v1648_v46, 1 }
 0x2a6   :  { %3047 = vmatpush.msrb.mxu1 %v4342_v26  ;;  %v1901_v51 = vsub.f32 %v1791_v48, %v4359_v9  ;;  %1897 = vmatmul.f32.gmra.mxu2 %v1896_v49  ;;  %v1650_v52 = vadd.f32 %v1649_v50, %v1648_v46 }
 0x2a7   :  { %2015 = vmatmul.f32.gmra.mxu3 %v4359_v9 }
 0x2a8   :  { %v1672_v53 = vmul.f32 %v4284_v0, %v1650_v52  ;;  %v3206_v54 = vmul.f32 %v1650_v52, %v1650_v52  ;;  %v1902_v16 = vand.u32 4294901760, %v1901_v51 }
 0x2a9   :  { %2108 = vmatmul.f32.gmra.mxu0 %v1901_v51 }
 0x2aa   :  { %v1756_v55 = vpop.trf.xlu0  ;;  %v1673_v56 = vadd.f32 0.0001, %v1672_v53  ;;  %v3207_v57 = vsel %vm1688_vm11, %v3206_v54, 0.0  ;;  %v1903_v21 = vsub.f32 %v1901_v51, %v1902_v16  ;;  %2216 = vmatmul.f32.gmra.mxu1 %v1902_v16 }
 0x2ab   :  { %v1794_v60 = vsel %vm1762_vm7, %v1756_v55, 0  ;;  %3208 = vadd.xlane.f32.xlu1 %v3207_v57 }
 0x2ac   :  { %v4367_v3 = vand.u32 4294901760, %v1794_v60  ;;  %v1904_v4 = vand.u32 4294901760, %v1903_v21  ;;  %4017 = vrsqrt.f32 %v1673_v56  ;;  %vm1681_vm12 = vcmp.eq.f32.partialorder %v1673_v56, inf }
 0x2ad   :  { %v1684_v29 = vand.u32 2147483648, %v1673_v56  ;;  %vm1683_vm13 = vcmp.eq.f32.partialorder %v1673_v56, 0.0 }
 0x2ae   :  { %v1909_v5 = vsub.f32 %v1794_v60, %v4367_v3  ;;  %1905 = vmatmul.f32.gmra.mxu2 %v1904_v4 }
 0x2af   :  { %2019 = vmatmul.f32.gmra.mxu3 %v4367_v3 }
 0x2b0   :  { %v1910_v0 = vand.u32 4294901760, %v1909_v5 }
 0x2b1   :  { %2113 = vmatmul.f32.gmra.mxu0 %v1909_v5 }
 0x2b2   :  { %v4018_v6 = vpop.eup %4017  ;;  %v1757_v8 = vpop.trf.xlu0  ;;  %v1911_v47 = vsub.f32 %v1909_v5, %v1910_v0  ;;  %2222 = vmatmul.f32.gmra.mxu1 %v1910_v0 }
 0x2b3   :  { %v1797_v39 = vsel %vm1762_vm7, %v1757_v8, 0  ;;  %v1675_v7 = vmul.f32 %v4018_v6, %v1673_v56 }
 0x2b4   :  { %v4372_v11 = vand.u32 4294901760, %v1797_v39  ;;  %v1912_v61 = vand.u32 4294901760, %v1911_v47 }
 0x2b5   :  { %v1676_v12 = vmul.f32 %v4018_v6, %v1675_v7 }
 0x2b6   :  { %v1917_v13 = vsub.f32 %v1797_v39, %v4372_v11  ;;  %1913 = vmatmul.f32.gmra.mxu2 %v1912_v61 }
 0x2b7   :  { %2023 = vmatmul.f32.gmra.mxu3 %v4372_v11  ;;  %v1677_v14 = vmul.f32 0.5, %v1676_v12  ;;  %v4175_v12 = vmov 1024.0  }
 0x2b8   :  { %v1918_v18 = vand.u32 4294901760, %v1917_v13  ;;  %4019 = vrcp.f32 %v4175_v12 }
 0x2b9   :  { %v1678_v19 = vsub.f32 1.5, %v1677_v14  ;;  %2118 = vmatmul.f32.gmra.mxu0 %v1917_v13 }
 0x2ba   :  { %v1758_v63 = vpop.trf.xlu0  ;;  %v1919_v1 = vsub.f32 %v1917_v13, %v1918_v18  ;;  %2228 = vmatmul.f32.gmra.mxu1 %v1918_v18  ;;  %v4176_v18 = vmov 128.0  }
 0x2bb   :  { %v1800_v20 = vsel %vm1762_vm7, %v1758_v63, 0  ;;  %v1679_v22 = vmul.f32 %v4018_v6, %v1678_v19  ;;  %4021 = vrcp.f32 %v4176_v18 }
 0x2bc   :  { %v4377_v23 = vand.u32 4294901760, %v1800_v20  ;;  %v1920_v25 = vand.u32 4294901760, %v1919_v1 }
 0x2bd   :  { %v1680_v27 = vmul.f32 %v1679_v22, %v1673_v56 }
 0x2be   :  { %v1925_v28 = vsub.f32 %v1800_v20, %v4377_v23  ;;  %1921 = vmatmul.f32.gmra.mxu2 %v1920_v25 }
 0x2bf   :  { %2027 = vmatmul.f32.gmra.mxu3 %v4377_v23  ;;  %v1682_v30 = vsel %vm1681_vm12, %v1673_v56, %v1680_v27 }
 0x2c0   :  { %v1685_v62 = vsel %vm1683_vm13, %v1684_v29, %v1682_v30  ;;  %v1926_v34 = vand.u32 4294901760, %v1925_v28 }
 0x2c1   :  { %v1708_v35 = vsub.f32 1.0, %v1685_v62  ;;  %2123 = vmatmul.f32.gmra.mxu0 %v1925_v28 }
 0x2c2   :  { %v1759_v58 = vpop.trf.xlu0  ;;  %v1927_v36 = vsub.f32 %v1925_v28, %v1926_v34  ;;  %2234 = vmatmul.f32.gmra.mxu1 %v1926_v34 }
 0x2c3   :  { %v1803_v37 = vsel %vm1762_vm7, %v1759_v58, 0  ;;  %v1709_v38 = vmax.f32 %v1708_v35, 0.0 }
 0x2c4   :  { %v4382_v40 = vand.u32 4294901760, %v1803_v37  ;;  %v1928_v41 = vand.u32 4294901760, %v1927_v36 }
 0x2c5   :  { %v1710_v42 = vsel %vm1688_vm11, %v1709_v38, 0.0 }
 0x2c6   :  { %v1933_v44 = vsub.f32 %v1803_v37, %v4382_v40  ;;  %1711 = vadd.xlane.f32.xlu2 %v1710_v42  ;;  %1929 = vmatmul.f32.gmra.mxu2 %v1928_v41 }
 0x2c7   :  { %2031 = vmatmul.f32.gmra.mxu3 %v4382_v40 }
 0x2c8   :  { %v1934_v45 = vand.u32 4294901760, %v1933_v44 }
 0x2c9   :  { %2128 = vmatmul.f32.gmra.mxu0 %v1933_v44 }
 0x2ca   :  { %v1760_v46 = vpop.trf.xlu0  ;;  %v1935_v48 = vsub.f32 %v1933_v44, %v1934_v45  ;;  %2240 = vmatmul.f32.gmra.mxu1 %v1934_v45 }
 0x2cb   :  { %v1806_v49 = vsel %vm1762_vm7, %v1760_v46, 0 }
 0x2cc   :  { %v4388_v50 = vand.u32 4294901760, %v1806_v49  ;;  %v1936_v51 = vand.u32 4294901760, %v1935_v48 }
 0x2ce   :  { %v1941_v52 = vsub.f32 %v1806_v49, %v4388_v50  ;;  %1937 = vmatmul.f32.gmra.mxu2 %v1936_v51 }
 0x2cf   :  { %2035 = vmatmul.f32.gmra.mxu3 %v4388_v50 }
 0x2d0   :  { %v1942_v53 = vand.u32 4294901760, %v1941_v52 }
 0x2d2   :  { %v1761_v54 = vpop.trf.xlu0  ;;  %v1943_v16 = vsub.f32 %v1941_v52, %v1942_v53 }
 0x2d3   :  { %v1809_v55 = vsel %vm1762_vm7, %v1761_v54, 0 }
 0x2d4   :  { %v4393_v56 = vand.u32 4294901760, %v1809_v55  ;;  %v1944_v57 = vand.u32 4294901760, %v1943_v16 }
 0x2d6   :  { %v1949_v21 = vsub.f32 %v1809_v55, %v4393_v56  ;;  %1945 = vmatmul.f32.gmra.mxu2 %v1944_v57 }
 0x2d7   :  { %2039 = vmatmul.f32.gmra.mxu3 %v4393_v56 }
 0x2d8   :  { %v1950_v60 = vand.u32 4294901760, %v1949_v21 }
 0x2da   :  { %v1951_v4 = vsub.f32 %v1949_v21, %v1950_v60 }
 0x2dc   :  { %v1952_v5 = vand.u32 4294901760, %v1951_v4 }
 0x2dd   :  { %v4412_v62 = vpop.f32.mrf.mxu0 }
 0x2de   :  { %1953 = vmatmul.f32.gmra.mxu2 %v1952_v5 }
 0x2df   :  { %2246 = vmatmul.f32.vlgmr.msrb.gmra.mxu3 %v1942_v53 }
 0x2e0   :  { %2849 = vmatpush.msrb.mxu3 %v4342_v26 }
 0x2e1   :  { %v1980_v0 = vpop.f32.mrf.mxu3 }
 0x2e5   :  { %v4420_v51 = vpop.f32.mrf.mxu0 }
 0x2e6   :  { %2133 = vmatmul.f32.vlgmr.msrb.gmra.mxu2 %v1941_v52 }
 0x2e7   :  { %2252 = vmatmul.f32.gmra.mxu3 %v1950_v60  ;;  %2751 = vmatpush.msrb.mxu2 %v4351_v32  ;;  %v4020_v32 = vpop.eup %4019 }
 0x2e8   :  { %v1613_v19 = vmul.f32 1024.0, %v4020_v32  ;;  %v4022_v22 = vpop.eup %4021  ;;  %vm1617_vm14 = vweird.f32 %v4020_v32 }
 0x2e9   :  { %v1834_v6 = vpop.f32.mrf.mxu2  ;;  %v1984_v8 = vpop.f32.mrf.mxu3  ;;  %v1700_v30 = vmul.f32 128.0, %v4022_v22  ;;  %vm1704_vm15 = vweird.f32 %v4022_v22 }
 0x2ea   :  { %v4399_v47 = vadd.f32 %v1980_v0, %v1834_v6  ;;  %v1614_v20 = vsub.f32 1.0, %v1613_v19 }
 0x2eb   :  { %v1701_v38 = vsub.f32 1.0, %v1700_v30 }
 0x2ec   :  { %v1615_v29 = vmul.f32 %v4020_v32, %v1614_v20 }
 0x2ed   :  { %v4428_v0 = vpop.f32.mrf.mxu0 }
 0x2ee   :  { %2138 = vmatmul.f32.gmra.mxu2 %v1949_v21  ;;  %v1616_v37 = vadd.f32 %v4020_v32, %v1615_v29 }
 0x2ef   :  { %2358 = vmatmul.f32.vlgmr.msra.gmra.mxu3 %v4286_v59 }
 0x2f0   :  { %v1618_v49 = vsel %vm1617_vm14, %v4020_v32, %v1616_v37 }
 0x2f1   :  { %v1842_v39 = vpop.f32.mrf.mxu2  ;;  %v1988_v7 = vpop.f32.mrf.mxu3 }
 0x2f2   :  { %v4402_v61 = vadd.f32 %v1984_v8, %v1842_v39 }
 0x2f6   :  { %2276 = vmatmul.f32.vlgmr.msra.gmra.mxu2 %v4286_v59 }
 0x2f7   :  { %2362 = vmatmul.f32.gmra.mxu3 %v4296_v10 }
 0x2f9   :  { %v1850_v26 = vpop.f32.mrf.mxu2  ;;  %v1992_v13 = vpop.f32.mrf.mxu3 }
 0x2fa   :  { %v4406_v14 = vadd.f32 %v1988_v7, %v1850_v26  ;;  %v4437_v7 = vpop.f32.mrf.mxu0 }
 0x2fe   :  { %2280 = vmatmul.f32.gmra.mxu2 %v4296_v10  ;;  %v4416_v10 = vpop.f32.mrf.mxu1 }
 0x2ff   :  { %2366 = vmatmul.f32.gmra.mxu3 %v4304_v15 }
 0x301   :  { %v1858_v63 = vpop.f32.mrf.mxu2  ;;  %v1996_v1 = vpop.f32.mrf.mxu3 }
 0x302   :  { %v4410_v25 = vadd.f32 %v1992_v13, %v1858_v63  ;;  %v1604_v59 = vpop.xlane.xlu1 %1603  ;;  %v4446_v32 = vpop.f32.mrf.mxu0 }
 0x303   :  { %v1605_v27 = vrot.slane %v1604_v59, 4 }
 0x305   :  { %v1606_v28 = vadd.f32 %v1605_v27, %v1604_v59 }
 0x306   :  { %2284 = vmatmul.f32.gmra.mxu2 %v4304_v15  ;;  %v1702_v15 = vmul.f32 %v4022_v22, %v1701_v38  ;;  %v4424_v53 = vpop.f32.mrf.mxu1 }
 0x307   :  { %v1607_v34 = vrot.slane %v1606_v28, 2  ;;  %2370 = vmatmul.f32.gmra.mxu3 %v4310_v24 }
 0x308   :  { %v1703_v57 = vadd.f32 %v4022_v22, %v1702_v15 }
 0x309   :  { %v1866_v35 = vpop.f32.mrf.mxu2  ;;  %v2000_v58 = vpop.f32.mrf.mxu3  ;;  %v1608_v36 = vadd.f32 %v1607_v34, %v1606_v28 }
 0x30a   :  { %v4418_v41 = vadd.f32 %v1996_v1, %v1866_v35  ;;  %v1691_v42 = vpop.xlane.xlu1 %1690  ;;  %v1705_v5 = vsel %vm1704_vm15, %v4022_v22, %v1703_v57  ;;  %v4454_v1 = vpop.f32.mrf.mxu0 }
 0x30b   :  { %v1692_v44 = vrot.slane %v1691_v42, 4  ;;  %v1609_v45 = vrot.slane %v1608_v36, 1 }
 0x30d   :  { %v1693_v46 = vadd.f32 %v1692_v44, %v1691_v42  ;;  %v1610_v48 = vadd.f32 %v1609_v45, %v1608_v36 }
 0x30e   :  { %2288 = vmatmul.f32.gmra.mxu2 %v4310_v24  ;;  %v4432_v24 = vpop.f32.mrf.mxu1 }
 0x30f   :  { %v1694_v52 = vrot.slane %v1693_v46, 2  ;;  %3973 = vpush %v1610_v48  ;;  %2374 = vmatmul.f32.gmra.mxu3 %v4315_v33 }
 0x310   :  { %3975 = vpush %v1618_v49 }
 0x311   :  { %v1874_v54 = vpop.f32.mrf.mxu2  ;;  %v2004_v16 = vpop.f32.mrf.mxu3  ;;  %v1695_v55 = vadd.f32 %v1694_v52, %v1693_v46 }
 0x312   :  { %v4426_v21 = vadd.f32 %v2000_v58, %v1874_v54  ;;  %v4460_v27 = vpop.f32.mrf.mxu0 }
 0x313   :  { %v1696_v60 = vrot.slane %v1695_v55, 1 }
 0x315   :  { %v1697_v4 = vadd.f32 %v1696_v60, %v1695_v55 }
 0x316   :  { %2292 = vmatmul.f32.gmra.mxu2 %v4315_v33  ;;  %v4442_v33 = vpop.f32.mrf.mxu1 }
 0x317   :  { %3977 = vpush %v1697_v4  ;;  %2378 = vmatmul.f32.gmra.mxu3 %v4320_v43 }
 0x318   :  { %3979 = vpush %v1705_v5 }
 0x319   :  { %v1882_v6 = vpop.f32.mrf.mxu2  ;;  %v2008_v8 = vpop.f32.mrf.mxu3 }
 0x31a   :  { %v4434_v39 = vadd.f32 %v2004_v16, %v1882_v6 }
 0x31e   :  { %2296 = vmatmul.f32.gmra.mxu2 %v4320_v43  ;;  %v4450_v43 = vpop.f32.mrf.mxu1 }
 0x31f   :  { %2382 = vmatmul.f32.gmra.mxu3 %v4331_v2 }
 0x321   :  { %v1890_v12 = vpop.f32.mrf.mxu2  ;;  %v2012_v26 = vpop.f32.mrf.mxu3 }
 0x322   :  { %v4440_v13 = vadd.f32 %v2008_v8, %v1890_v12 }
 0x326   :  { %2300 = vmatmul.f32.gmra.mxu2 %v4331_v2  ;;  %v4456_v2 = vpop.f32.mrf.mxu1 }
 0x327   :  { %2386 = vmatmul.f32.gmra.mxu3 %v4336_v17 }
 0x329   :  { %v1898_v18 = vpop.f32.mrf.mxu2 }
 0x32a   :  { %v2016_v19 = vpop.f32.mrf.mxu3  ;;  %v4448_v63 = vadd.f32 %v2012_v26, %v1898_v18 }
 0x32e   :  { %2304 = vmatmul.f32.gmra.mxu2 %v4336_v17  ;;  %v4464_v35 = vpop.f32.mrf.mxu1 }
 0x32f   :  { %2390 = vmatmul.f32.gmra.mxu3 %v4347_v31 }
 0x331   :  { %v1906_v20 = vpop.f32.mrf.mxu2 }
 0x332   :  { %v2020_v22 = vpop.f32.mrf.mxu3  ;;  %v2017_v59 = vadd.f32 %v2016_v19, %v1906_v20 }
 0x336   :  { %2308 = vmatmul.f32.gmra.mxu2 %v4347_v31  ;;  %v4469_v31 = vpop.f32.mrf.mxu0 }
 0x337   :  { %2394 = vmatmul.f32.gmra.mxu3 %v4359_v9 }
 0x339   :  { %v1712_v28 = vpop.xlane.xlu2 %1711  ;;  %v1914_v29 = vpop.f32.mrf.mxu2 }
 0x33a   :  { %v1713_v30 = vrot.slane %v1712_v28, 4  ;;  %v4462_v34 = vadd.f32 %v2020_v22, %v1914_v29  ;;  %v2024_v17 = vpop.f32.mrf.mxu3 }
 0x33c   :  { %v1714_v58 = vadd.f32 %v1713_v30, %v1712_v28 }
 0x33e   :  { %v1715_v36 = vrot.slane %v1714_v58, 2  ;;  %v2438_v37 = vpop.trf.xlu0  ;;  %2312 = vmatmul.f32.gmra.mxu2 %v4359_v9  ;;  %v4479_v9 = vpop.f32.mrf.mxu1 }
 0x33f   :  { %v2455_v38 = vsel %vm1762_vm7, %v2438_v37, 0  ;;  %2398 = vmatmul.f32.gmra.mxu3 %v4367_v3  ;;  %v4488_v60 = vpop.f32.mrf.mxu0 }
 0x340   :  { %v4471_v42 = vand.u32 4294901760, %v2455_v38  ;;  %v1716_v44 = vadd.f32 %v1715_v36, %v1714_v58  ;;  %s3974_s2 = spop %3973 }
 0x341   :  { %v1922_v45 = vpop.f32.mrf.mxu2  ;;  %s3976_s4 = spop %3975 }
 0x342   :  { %v4474_v46 = vsub.f32 %v2455_v38, %v4471_v42  ;;  %v4476_v48 = vadd.f32 %v2024_v17, %v1922_v45  ;;  %v2028_v49 = vpop.f32.mrf.mxu3  ;;  %2670 = vmatmul.f32.vlgmr.msra.gmra.mxu1 %v4471_v42  ;;  %v1717_v15 = vrot.slane %v1716_v44, 1  ;;  %s1620_s25 = smul.f32 %s3976_s4, %s3974_s2 }
 0x344   :  { %v2521_v52 = vand.u32 4294901760, %v4474_v46  ;;  %v1718_v54 = vadd.f32 %v1717_v15, %v1716_v44  ;;  %s3227_s6 = smul.f32 25.0, %s1620_s25 }
 0x346   :  { %v2522_v16 = vsub.f32 %v4474_v46, %v2521_v52  ;;  %v2439_v55 = vpop.trf.xlu0  ;;  %3981 = vpush %v1718_v54  ;;  %2316 = vmatmul.f32.gmra.mxu2 %v4367_v3  ;;  %v4498_v3 = vpop.f32.mrf.mxu1 }
 0x347   :  { %v2458_v57 = vsel %vm1762_vm7, %v2439_v55, 0  ;;  %2402 = vmatmul.f32.gmra.mxu3 %v4372_v11  ;;  %v2109_v28 = vpop.f32.mrf.mxu0 }
 0x348   :  { %v2523_v4 = vand.u32 4294901760, %v2522_v16  ;;  %v4490_v5 = vand.u32 4294901760, %v2458_v57  ;;  %v2110_v17 = vadd.f32 %v2109_v28, %v2017_v59  ;;  %s3978_s17 = spop %3977 }
 0x349   :  { %v1930_v6 = vpop.f32.mrf.mxu2  ;;  %s3980_s18 = spop %3979 }
 0x34a   :  { %v4493_v8 = vsub.f32 %v2458_v57, %v4490_v5  ;;  %v4495_v12 = vadd.f32 %v2028_v49, %v1930_v6  ;;  %v2032_v26 = vpop.f32.mrf.mxu3  ;;  %2524 = vmatmul.f32.vlgmr.msra.gmra.mxu0 %v2523_v4  ;;  %2674 = vmatmul.f32.gmra.mxu1 %v4490_v5  ;;  %s1707_s21 = smul.f32 %s3980_s18, %s3978_s17 }
 0x34c   :  { %v2529_v18 = vand.u32 4294901760, %v4493_v8 }
 0x34e   :  { %v2440_v19 = vpop.trf.xlu0  ;;  %2320 = vmatmul.f32.gmra.mxu2 %v4372_v11  ;;  %v2530_v20 = vsub.f32 %v4493_v8, %v2529_v18  ;;  %v2217_v38 = vpop.f32.mrf.mxu1 }
 0x34f   :  { %v2461_v22 = vsel %vm1762_vm7, %v2440_v19, 0  ;;  %2406 = vmatmul.f32.gmra.mxu3 %v4377_v23  ;;  %v4515_v44 = vadd.f32 %v2217_v38, %v2110_v17 }
 0x350   :  { %v4507_v29 = vand.u32 4294901760, %v2461_v22  ;;  %v2531_v30 = vand.u32 4294901760, %v2530_v20 }
 0x351   :  { %v1938_v58 = vpop.f32.mrf.mxu2 }
 0x352   :  { %v4510_v36 = vsub.f32 %v2461_v22, %v4507_v29  ;;  %v4512_v37 = vadd.f32 %v2032_v26, %v1938_v58  ;;  %v2036_v11 = vpop.f32.mrf.mxu3  ;;  %2532 = vmatmul.f32.gmra.mxu0 %v2531_v30  ;;  %2678 = vmatmul.f32.gmra.mxu1 %v4507_v29 }
 0x354   :  { %v2537_v45 = vand.u32 4294901760, %v4510_v36 }
 0x356   :  { %v2441_v49 = vpop.trf.xlu0  ;;  %2324 = vmatmul.f32.gmra.mxu2 %v4377_v23  ;;  %v2538_v59 = vsub.f32 %v4510_v36, %v2537_v45 }
 0x357   :  { %v2464_v15 = vsel %vm1762_vm7, %v2441_v49, 0  ;;  %2410 = vmatmul.f32.gmra.mxu3 %v4382_v40 }
 0x358   :  { %v4524_v54 = vand.u32 4294901760, %v2464_v15  ;;  %v2539_v16 = vand.u32 4294901760, %v2538_v59 }
 0x359   :  { %v1946_v55 = vpop.f32.mrf.mxu2 }
 0x35a   :  { %v4527_v57 = vsub.f32 %v2464_v15, %v4524_v54  ;;  %v2037_v4 = vadd.f32 %v2036_v11, %v1946_v55  ;;  %v2040_v6 = vpop.f32.mrf.mxu3  ;;  %2540 = vmatmul.f32.gmra.mxu0 %v2539_v16  ;;  %2682 = vmatmul.f32.gmra.mxu1 %v4524_v54 }
 0x35c   :  { %v2545_v23 = vand.u32 4294901760, %v4527_v57 }
 0x35e   :  { %v2442_v26 = vpop.trf.xlu0  ;;  %2328 = vmatmul.f32.gmra.mxu2 %v4382_v40  ;;  %v2546_v19 = vsub.f32 %v4527_v57, %v2545_v23 }
 0x35f   :  { %v2467_v20 = vsel %vm1762_vm7, %v2442_v26, 0  ;;  %2414 = vmatmul.f32.gmra.mxu3 %v4388_v50 }
 0x360   :  { %v4537_v22 = vand.u32 4294901760, %v2467_v20  ;;  %v2547_v28 = vand.u32 4294901760, %v2546_v19 }
 0x361   :  { %v1954_v30 = vpop.f32.mrf.mxu2 }
 0x362   :  { %v4540_v17 = vsub.f32 %v2467_v20, %v4537_v22  ;;  %v2041_v58 = vadd.f32 %v2040_v6, %v1954_v30  ;;  %v2247_v11 = vpop.f32.mrf.mxu3  ;;  %2548 = vmatmul.f32.gmra.mxu0 %v2547_v28  ;;  %2686 = vmatmul.f32.gmra.mxu1 %v4537_v22 }
 0x364   :  { %v4893_v40 = vand.u32 4294901760, %v4540_v17 }
 0x366   :  { %v2443_v38 = vpop.trf.xlu0  ;;  %2332 = vmatmul.f32.gmra.mxu2 %v4388_v50  ;;  %v2554_v49 = vsub.f32 %v4540_v17, %v4893_v40 }
 0x367   :  { %v2470_v59 = vsel %vm1762_vm7, %v2443_v38, 0  ;;  %2418 = vmatmul.f32.gmra.mxu3 %v4393_v56 }
 0x368   :  { %v4550_v15 = vand.u32 4294901760, %v2470_v59  ;;  %v2555_v16 = vand.u32 4294901760, %v2554_v49 }
 0x369   :  { %v2134_v55 = vpop.f32.mrf.mxu2 }
 0x36a   :  { %v4553_v6 = vsub.f32 %v2470_v59, %v4550_v15  ;;  %v2135_v26 = vadd.f32 %v2134_v55, %v2037_v4  ;;  %v4555_v19 = vpop.f32.mrf.mxu3  ;;  %2556 = vmatmul.f32.gmra.mxu0 %v2555_v16  ;;  %2690 = vmatmul.f32.gmra.mxu1 %v4550_v15 }
 0x36c   :  { %v4891_v50 = vand.u32 4294901760, %v4553_v6 }
 0x36e   :  { %v2444_v20 = vpop.trf.xlu0  ;;  %2336 = vmatmul.f32.gmra.mxu2 %v4393_v56  ;;  %v2562_v28 = vsub.f32 %v4553_v6, %v4891_v50  ;;  %v2065_v56 = vadd.f32 %v4412_v62, %v4399_v47 }
 0x36f   :  { %v2473_v30 = vsel %vm1762_vm7, %v2444_v20, 0  ;;  %2853 = vmatmul.f32.vlgmr.msrb.gmra.mxu3 %v2521_v52 }
 0x370   :  { %v4566_v4 = vand.u32 4294901760, %v2473_v30  ;;  %v2563_v38 = vand.u32 4294901760, %v2562_v28 }
 0x371   :  { %v2139_v49 = vpop.f32.mrf.mxu2 }
 0x372   :  { %v4569_v59 = vsub.f32 %v2473_v30, %v4566_v4  ;;  %v2140_v16 = vadd.f32 %v2139_v49, %v2041_v58  ;;  %v2359_v55 = vpop.f32.mrf.mxu3  ;;  %2564 = vmatmul.f32.gmra.mxu0 %v2563_v38  ;;  %2694 = vmatmul.f32.gmra.mxu1 %v4566_v4  ;;  %v2164_v58 = vadd.f32 %v4416_v10, %v2065_v56 }
 0x374   :  { %v4892_v20 = vand.u32 4294901760, %v4569_v59 }
 0x376   :  { %v2445_v50 = vpop.trf.xlu0  ;;  %2754 = vmatmul.f32.vlgmr.msrb.gmra.mxu2 %v4474_v46  ;;  %v2570_v52 = vsub.f32 %v4569_v59, %v4892_v20 }
 0x377   :  { %v2476_v28 = vsel %vm1762_vm7, %v2445_v50, 0  ;;  %2859 = vmatmul.f32.gmra.mxu3 %v2529_v18  ;;  %v2070_v50 = vadd.f32 %v4420_v51, %v4402_v61  ;;  %v4602_v51 = vadd.f32 %v2247_v11, %v2135_v26  ;;  %s3982_s19 = spop %3981 }
 0x378   :  { %v4583_v30 = vand.u32 4294901760, %v2476_v28  ;;  %v2571_v38 = vand.u32 4294901760, %v2570_v52  ;;  %s1728_s20 = smul.f32 %s3982_s19, %s3980_s18 }
 0x379   :  { %v2277_v47 = vpop.f32.mrf.mxu2  ;;  %v2170_v52 = vadd.f32 %v4424_v53, %v2070_v50 }
 0x37a   :  { %v4586_v62 = vsub.f32 %v2476_v28, %v4583_v30  ;;  %v2278_v49 = vadd.f32 %v2277_v47, %v2164_v58  ;;  %v2363_v46 = vpop.f32.mrf.mxu3  ;;  %2572 = vmatmul.f32.gmra.mxu0 %v2571_v38  ;;  %2698 = vmatmul.f32.gmra.mxu1 %v4583_v30  ;;  %s1729_s23 = sadd.f32 %s1728_s20, %s1707_s21 }
 0x37c   :  { %v2577_v20 = vand.u32 4294901760, %v4586_v62  ;;  %v2360_v18 = vadd.f32 %v2359_v55, %v2278_v49  ;;  %s3228_s27 = smul.f32 25.0, %s1729_s23 }
 0x37e   :  { %v2446_v40 = vpop.trf.xlu0  ;;  %2759 = vmatmul.f32.gmra.mxu2 %v4493_v8  ;;  %v2578_v10 = vsub.f32 %v4586_v62, %v2577_v20  ;;  %v3113_v47 = vmul.f32 %v2360_v18, %v2360_v18  ;;  %v4622_v18 = vadd.f32 %v4555_v19, %v2140_v16  ;;  %s3229_s3 = sadd.f32 %s3228_s27, %s3227_s6 }
 0x37f   :  { %v2479_v56 = vsel %vm1762_vm7, %v2446_v40, 0  ;;  %2865 = vmatmul.f32.gmra.mxu3 %v2537_v45  ;;  %v2075_v40 = vadd.f32 %v4428_v0, %v4406_v14 }
 0x380   :  { %v4600_v28 = vand.u32 4294901760, %v2479_v56  ;;  %v2579_v61 = vand.u32 4294901760, %v2578_v10 }
 0x381   :  { %v2281_v55 = vpop.f32.mrf.mxu2  ;;  %v2176_v26 = vadd.f32 %v4432_v24, %v2075_v40  ;;  %v2080_v24 = vadd.f32 %v4437_v7, %v4410_v25 }
 0x382   :  { %v4605_v58 = vsub.f32 %v2479_v56, %v4600_v28  ;;  %v2282_v8 = vadd.f32 %v2281_v55, %v2170_v52  ;;  %v2367_v38 = vpop.f32.mrf.mxu3  ;;  %2580 = vmatmul.f32.gmra.mxu0 %v2579_v61  ;;  %2702 = vmatmul.f32.gmra.mxu1 %v4600_v28 }
 0x384   :  { %v2585_v45 = vand.u32 4294901760, %v4605_v58  ;;  %v2364_v53 = vadd.f32 %v2363_v46, %v2282_v8 }
 0x386   :  { %v3114_v49 = vmul.f32 %v2364_v53, %v2364_v53  ;;  %v2447_v50 = vpop.trf.xlu0  ;;  %2764 = vmatmul.f32.gmra.mxu2 %v4510_v36  ;;  %v2586_v11 = vsub.f32 %v4605_v58, %v2585_v45  ;;  %v4894_v53 = vand.u32 4294901760, %v4540_v17 }
 0x387   :  { %v2482_v10 = vsel %vm1762_vm7, %v2447_v50, 0  ;;  %2871 = vmatmul.f32.gmra.mxu3 %v2545_v23 }
 0x388   :  { %v3129_v14 = vadd.f32 %v3114_v49, %v3113_v47  ;;  %v4619_v0 = vand.u32 4294901760, %v2482_v10  ;;  %v2587_v46 = vand.u32 4294901760, %v2586_v11  ;;  %v2182_v47 = vadd.f32 %v4442_v33, %v2080_v24 }
 0x389   :  { %v2285_v56 = vpop.f32.mrf.mxu2  ;;  %v4895_v24 = vand.u32 4294901760, %v4553_v6 }
 0x38a   :  { %v4625_v36 = vsub.f32 %v2482_v10, %v4619_v0  ;;  %v2286_v52 = vadd.f32 %v2285_v56, %v2176_v26  ;;  %v2371_v61 = vpop.f32.mrf.mxu3  ;;  %2588 = vmatmul.f32.gmra.mxu0 %v2587_v46  ;;  %2706 = vmatmul.f32.gmra.mxu1 %v4619_v0  ;;  %v2085_v26 = vadd.f32 %v4446_v32, %v4418_v41 }
 0x38c   :  { %v2593_v23 = vand.u32 4294901760, %v4625_v36  ;;  %v2368_v55 = vadd.f32 %v2367_v38, %v2286_v52 }
 0x38e   :  { %v3115_v8 = vmul.f32 %v2368_v55, %v2368_v55  ;;  %v2448_v40 = vpop.trf.xlu0  ;;  %2769 = vmatmul.f32.gmra.mxu2 %v4527_v57  ;;  %v2594_v19 = vsub.f32 %v4625_v36, %v2593_v23  ;;  %v2188_v55 = vadd.f32 %v4450_v43, %v2085_v26  ;;  %v4896_v26 = vand.u32 4294901760, %v4569_v59 }
 0x38f   :  { %v2485_v16 = vsel %vm1762_vm7, %v2448_v40, 0  ;;  %2877 = vmatmul.f32.gmra.mxu3 %v4894_v53  ;;  %v2090_v53 = vadd.f32 %v4454_v1, %v4426_v21 }
 0x390   :  { %v3130_v49 = vadd.f32 %v3129_v14, %v3115_v8  ;;  %v4639_v25 = vand.u32 4294901760, %v2485_v16  ;;  %v2595_v7 = vand.u32 4294901760, %v2594_v19 }
 0x391   :  { %v2289_v38 = vpop.f32.mrf.mxu2 }
 0x392   :  { %v4642_v50 = vsub.f32 %v2485_v16, %v4639_v25  ;;  %v2290_v57 = vadd.f32 %v2289_v38, %v2182_v47  ;;  %v2375_v11 = vpop.f32.mrf.mxu3  ;;  %2596 = vmatmul.f32.gmra.mxu0 %v2595_v7  ;;  %2710 = vmatmul.f32.gmra.mxu1 %v4639_v25 }
 0x394   :  { %v2601_v10 = vand.u32 4294901760, %v4642_v50  ;;  %v2372_v46 = vadd.f32 %v2371_v61, %v2290_v57  ;;  %v4658_v61 = vpop.f32.mrf.mxu1 }
 0x396   :  { %v3116_v33 = vmul.f32 %v2372_v46, %v2372_v46  ;;  %v2449_v14 = vpop.trf.xlu0  ;;  %2774 = vmatmul.f32.gmra.mxu2 %v4540_v17  ;;  %v2602_v56 = vsub.f32 %v4642_v50, %v2601_v10  ;;  %v2194_v46 = vadd.f32 %v4456_v2, %v2090_v53  ;;  %v2095_v2 = vadd.f32 %v4460_v27, %v4434_v39 }
 0x397   :  { %v2488_v52 = vsel %vm1762_vm7, %v2449_v14, 0  ;;  %2883 = vmatmul.f32.gmra.mxu3 %v4895_v24 }
 0x398   :  { %v3131_v8 = vadd.f32 %v3130_v49, %v3116_v33  ;;  %v4656_v41 = vand.u32 4294901760, %v2488_v52  ;;  %v2603_v32 = vand.u32 4294901760, %v2602_v56 }
 0x399   :  { %v2293_v40 = vpop.f32.mrf.mxu2 }
 0x39a   :  { %v4661_v17 = vsub.f32 %v2488_v52, %v4656_v41  ;;  %v2294_v19 = vadd.f32 %v2293_v40, %v2188_v55  ;;  %v2379_v16 = vpop.f32.mrf.mxu3  ;;  %2604 = vmatmul.f32.gmra.mxu0 %v2603_v32  ;;  %2714 = vmatmul.f32.gmra.mxu1 %v4656_v41 }
 0x39c   :  { %v2609_v43 = vand.u32 4294901760, %v4661_v17  ;;  %v2376_v47 = vadd.f32 %v2375_v11, %v2294_v19  ;;  %v4677_v11 = vpop.f32.mrf.mxu0  ;;  %v4683_v24 = vpop.f32.mrf.mxu1 }
 0x39e   :  { %v3117_v49 = vmul.f32 %v2376_v47, %v2376_v47  ;;  %v2450_v7 = vpop.trf.xlu0  ;;  %2779 = vmatmul.f32.gmra.mxu2 %v4553_v6  ;;  %v2610_v38 = vsub.f32 %v4661_v17, %v2609_v43  ;;  %v2200_v47 = vadd.f32 %v4464_v35, %v2095_v2 }
 0x39f   :  { %v2491_v57 = vsel %vm1762_vm7, %v2450_v7, 0  ;;  %2889 = vmatmul.f32.gmra.mxu3 %v4896_v26 }
 0x3a0   :  { %v3132_v33 = vadd.f32 %v3131_v8, %v3117_v49  ;;  %v4675_v21 = vand.u32 4294901760, %v2491_v57  ;;  %v2611_v1 = vand.u32 4294901760, %v2610_v38 }
 0x3a1   :  { %v2297_v14 = vpop.f32.mrf.mxu2 }
 0x3a2   :  { %v4680_v6 = vsub.f32 %v2491_v57, %v4675_v21  ;;  %v2298_v56 = vadd.f32 %v2297_v14, %v2194_v46  ;;  %v2383_v52 = vpop.f32.mrf.mxu3  ;;  %2612 = vmatmul.f32.gmra.mxu0 %v2611_v1  ;;  %2718 = vmatmul.f32.gmra.mxu1 %v4675_v21 }
 0x3a4   :  { %v2617_v55 = vand.u32 4294901760, %v4680_v6  ;;  %v2380_v8 = vadd.f32 %v2379_v16, %v2298_v56  ;;  %v4702_v57 = vpop.f32.mrf.mxu0  ;;  %v4707_v46 = vpop.f32.mrf.mxu1 }
 0x3a6   :  { %v3118_v32 = vmul.f32 %v2380_v8, %v2380_v8  ;;  %v2451_v40 = vpop.trf.xlu0  ;;  %2784 = vmatmul.f32.gmra.mxu2 %v4569_v59  ;;  %v2618_v19 = vsub.f32 %v4680_v6, %v2617_v55 }
 0x3a7   :  { %v2494_v53 = vsel %vm1762_vm7, %v2451_v40, 0  ;;  %2895 = vmatmul.f32.gmra.mxu3 %v2577_v20  ;;  %v2100_v20 = vadd.f32 %v4469_v31, %v4440_v13 }
 0x3a8   :  { %v3133_v49 = vadd.f32 %v3132_v33, %v3118_v32  ;;  %v4696_v39 = vand.u32 4294901760, %v2494_v53  ;;  %v2619_v27 = vand.u32 4294901760, %v2618_v19  ;;  %v2105_v19 = vadd.f32 %v4488_v60, %v4448_v63 }
 0x3a9   :  { %v2301_v16 = vpop.f32.mrf.mxu2  ;;  %v2206_v13 = vadd.f32 %v4479_v9, %v2100_v20 }
 0x3aa   :  { %v4699_v7 = vsub.f32 %v2494_v53, %v4696_v39  ;;  %v2302_v59 = vadd.f32 %v2301_v16, %v2200_v47  ;;  %v2387_v38 = vpop.f32.mrf.mxu3  ;;  %2620 = vmatmul.f32.gmra.mxu0 %v2619_v27  ;;  %2722 = vmatmul.f32.gmra.mxu1 %v4696_v39  ;;  %v2212_v63 = vadd.f32 %v4498_v3, %v2105_v19 }
 0x3ac   :  { %v2625_v35 = vand.u32 4294901760, %v4699_v7  ;;  %v2384_v26 = vadd.f32 %v2383_v52, %v2302_v59  ;;  %v2124_v9 = vpop.f32.mrf.mxu0  ;;  %v4730_v16 = vpop.f32.mrf.mxu1 }
 0x3ae   :  { %v3119_v33 = vmul.f32 %v2384_v26, %v2384_v26  ;;  %v2452_v1 = vpop.trf.xlu0  ;;  %2789 = vmatmul.f32.gmra.mxu2 %v4586_v62  ;;  %v2626_v14 = vsub.f32 %v4699_v7, %v2625_v35 }
 0x3af   :  { %v2497_v56 = vsel %vm1762_vm7, %v2452_v1, 0  ;;  %2901 = vmatmul.f32.gmra.mxu3 %v2585_v45 }
 0x3b0   :  { %v3134_v31 = vadd.f32 %v3133_v49, %v3119_v33  ;;  %v4717_v2 = vand.u32 4294901760, %v2497_v56  ;;  %v2627_v52 = vand.u32 4294901760, %v2626_v14 }
 0x3b1   :  { %v2305_v8 = vpop.f32.mrf.mxu2 }
 0x3b2   :  { %v4720_v32 = vsub.f32 %v2497_v56, %v4717_v2  ;;  %v2306_v62 = vadd.f32 %v2305_v8, %v2206_v13  ;;  %v2391_v40 = vpop.f32.mrf.mxu3  ;;  %2628 = vmatmul.f32.gmra.mxu0 %v2627_v52  ;;  %2726 = vmatmul.f32.gmra.mxu1 %v4717_v2 }
 0x3b4   :  { %v2633_v45 = vand.u32 4294901760, %v4720_v32  ;;  %v2388_v53 = vadd.f32 %v2387_v38, %v2306_v62 }
 0x3b6   :  { %v3120_v47 = vmul.f32 %v2388_v53, %v2388_v53  ;;  %v2453_v49 = vpop.trf.xlu0  ;;  %2794 = vmatmul.f32.gmra.mxu2 %v4605_v58  ;;  %v2634_v27 = vsub.f32 %v4720_v32, %v2633_v45 }
 0x3b7   :  { %v2500_v59 = vsel %vm1762_vm7, %v2453_v49, 0  ;;  %2907 = vmatmul.f32.gmra.mxu3 %v2593_v23  ;;  %v2129_v23 = vpop.f32.mrf.mxu0 }
 0x3b8   :  { %v3135_v60 = vadd.f32 %v3134_v31, %v3120_v47  ;;  %v4736_v38 = vand.u32 4294901760, %v2500_v59  ;;  %v2635_v20 = vand.u32 4294901760, %v2634_v27 }
 0x3b9   :  { %v2309_v26 = vpop.f32.mrf.mxu2 }
 0x3ba   :  { %v4739_v58 = vsub.f32 %v2500_v59, %v4736_v38  ;;  %v2310_v33 = vadd.f32 %v2309_v26, %v2212_v63  ;;  %v2395_v1 = vpop.f32.mrf.mxu3  ;;  %2636 = vmatmul.f32.gmra.mxu0 %v2635_v20  ;;  %2730 = vmatmul.f32.gmra.mxu1 %v4736_v38 }
 0x3bc   :  { %v2641_v14 = vand.u32 4294901760, %v4739_v58  ;;  %v2392_v56 = vadd.f32 %v2391_v40, %v2310_v33 }
 0x3be   :  { %v3121_v13 = vmul.f32 %v2392_v56, %v2392_v56  ;;  %2799 = vmatmul.f32.gmra.mxu2 %v4625_v36  ;;  %v2642_v3 = vsub.f32 %v4739_v58, %v2641_v14  ;;  %v2115_v36 = vadd.f32 %v4677_v11, %v4462_v34  ;;  %v2120_v34 = vadd.f32 %v4702_v57, %v4476_v48 }
 0x3bf   :  { %2913 = vmatmul.f32.gmra.mxu3 %v2601_v10  ;;  %v4749_v31 = vpop.f32.mrf.mxu1  ;;  %v2125_v48 = vadd.f32 %v2124_v9, %v4495_v12  ;;  %v2130_v12 = vadd.f32 %v2129_v23, %v4512_v37 }
 0x3c0   :  { %v3136_v52 = vadd.f32 %v3135_v60, %v3121_v13  ;;  %v2643_v8 = vand.u32 4294901760, %v2642_v3  ;;  %v2230_v20 = vadd.f32 %v4683_v24, %v2120_v34 }
 0x3c1   :  { %v2313_v62 = vpop.f32.mrf.mxu2  ;;  %v2236_v56 = vadd.f32 %v4707_v46, %v2125_v48 }
 0x3c2   :  { %v2314_v19 = vadd.f32 %v2313_v62, %v4515_v44  ;;  %v2399_v53 = vpop.f32.mrf.mxu3  ;;  %2644 = vmatmul.f32.gmra.mxu0 %v2643_v8  ;;  %3049 = vmatmul.f32.vlgmr.msrb.gmra.mxu1 %v4471_v42  ;;  %v2224_v44 = vadd.f32 %v4658_v61, %v2115_v36  ;;  %v2242_v8 = vadd.f32 %v4730_v16, %v2130_v12 }
 0x3c4   :  { %v2396_v40 = vadd.f32 %v2395_v1, %v2314_v19 }
 0x3c6   :  { %v3122_v47 = vmul.f32 %v2396_v40, %v2396_v40  ;;  %2804 = vmatmul.f32.gmra.mxu2 %v4642_v50 }
 0x3c7   :  { %2919 = vmatmul.f32.gmra.mxu3 %v2609_v43  ;;  %v4758_v10 = vpop.f32.mrf.mxu0  ;;  %v4760_v49 = vpop.f32.mrf.mxu1 }
 0x3c8   :  { %v3137_v27 = vadd.f32 %v3136_v52, %v3122_v47 }
 0x3c9   :  { %v2317_v59 = vpop.f32.mrf.mxu2 }
 0x3ca   :  { %v2318_v63 = vadd.f32 %v2317_v59, %v2224_v44  ;;  %v2403_v60 = vpop.f32.mrf.mxu3  ;;  %2967 = vmatmul.f32.vlgmr.msrb.gmra.mxu0 %v4471_v42  ;;  %3053 = vmatmul.f32.gmra.mxu1 %v4490_v5 }
 0x3cc   :  { %v2400_v50 = vadd.f32 %v2399_v53, %v2318_v63 }
 0x3ce   :  { %v3123_v11 = vmul.f32 %v2400_v50, %v2400_v50  ;;  %2809 = vmatmul.f32.gmra.mxu2 %v4661_v17 }
 0x3cf   :  { %2925 = vmatmul.f32.gmra.mxu3 %v2617_v55  ;;  %v4770_v43 = vpop.f32.mrf.mxu0  ;;  %v4772_v61 = vpop.f32.mrf.mxu1 }
 0x3d0   :  { %v3138_v26 = vadd.f32 %v3137_v27, %v3123_v11 }
 0x3d1   :  { %v2321_v42 = vpop.f32.mrf.mxu2 }
 0x3d2   :  { %v2322_v33 = vadd.f32 %v2321_v42, %v2230_v20  ;;  %v2407_v1 = vpop.f32.mrf.mxu3  ;;  %2971 = vmatmul.f32.gmra.mxu0 %v4490_v5  ;;  %3057 = vmatmul.f32.gmra.mxu1 %v4507_v29 }
 0x3d4   :  { %v2404_v17 = vadd.f32 %v2403_v60, %v2322_v33 }
 0x3d6   :  { %v3124_v57 = vmul.f32 %v2404_v17, %v2404_v17  ;;  %2814 = vmatmul.f32.gmra.mxu2 %v4680_v6 }
 0x3d7   :  { %2931 = vmatmul.f32.gmra.mxu3 %v2625_v35  ;;  %v4781_v55 = vpop.f32.mrf.mxu0  ;;  %v4783_v24 = vpop.f32.mrf.mxu1 }
 0x3d8   :  { %v3139_v13 = vadd.f32 %v3138_v26, %v3124_v57 }
 0x3d9   :  { %v2325_v3 = vpop.f32.mrf.mxu2 }
 0x3da   :  { %v2326_v5 = vadd.f32 %v2325_v3, %v2236_v56  ;;  %v2411_v52 = vpop.f32.mrf.mxu3  ;;  %2975 = vmatmul.f32.gmra.mxu0 %v4507_v29  ;;  %3061 = vmatmul.f32.gmra.mxu1 %v4524_v54  ;;  %v2680_v56 = vadd.f32 %v4772_v61, %v4781_v55 }
 0x3dc   :  { %v2408_v6 = vadd.f32 %v2407_v1, %v2326_v5  ;;  %v2676_v1 = vadd.f32 %v4760_v49, %v4770_v43 }
 0x3de   :  { %v3125_v9 = vmul.f32 %v2408_v6, %v2408_v6  ;;  %2819 = vmatmul.f32.gmra.mxu2 %v4699_v7 }
 0x3df   :  { %2937 = vmatmul.f32.gmra.mxu3 %v2633_v45  ;;  %v4792_v35 = vpop.f32.mrf.mxu0  ;;  %v4794_v46 = vpop.f32.mrf.mxu1 }
 0x3e0   :  { %v3140_v62 = vadd.f32 %v3139_v13, %v3125_v9 }
 0x3e1   :  { %v2329_v19 = vpop.f32.mrf.mxu2 }
 0x3e2   :  { %v2330_v29 = vadd.f32 %v2329_v19, %v2242_v8  ;;  %v2415_v53 = vpop.f32.mrf.mxu3  ;;  %2979 = vmatmul.f32.gmra.mxu0 %v4524_v54  ;;  %3065 = vmatmul.f32.gmra.mxu1 %v4537_v22 }
 0x3e4   :  { %v2412_v37 = vadd.f32 %v2411_v52, %v2330_v29  ;;  %v2684_v52 = vadd.f32 %v4783_v24, %v4792_v35 }
 0x3e6   :  { %v3126_v23 = vmul.f32 %v2412_v37, %v2412_v37  ;;  %2824 = vmatmul.f32.gmra.mxu2 %v4720_v32 }
 0x3e7   :  { %2943 = vmatmul.f32.gmra.mxu3 %v2641_v14  ;;  %v2557_v7 = vpop.f32.mrf.mxu0  ;;  %v4802_v45 = vpop.f32.mrf.mxu1 }
 0x3e8   :  { %v3141_v36 = vadd.f32 %v3140_v62, %v3126_v23  ;;  %v2688_v62 = vadd.f32 %v4794_v46, %v2557_v7 }
 0x3e9   :  { %v2333_v16 = vpop.f32.mrf.mxu2 }
 0x3ea   :  { %v2334_v40 = vadd.f32 %v2333_v16, %v4602_v51  ;;  %v2419_v47 = vpop.f32.mrf.mxu3  ;;  %2983 = vmatmul.f32.gmra.mxu0 %v4537_v22  ;;  %3069 = vmatmul.f32.gmra.mxu1 %v4550_v15 }
 0x3ec   :  { %v2416_v54 = vadd.f32 %v2415_v53, %v2334_v40 }
 0x3ee   :  { %v3127_v44 = vmul.f32 %v2416_v54, %v2416_v54  ;;  %2829 = vmatmul.f32.gmra.mxu2 %v4739_v58  ;;  %v2672_v58 = vadd.f32 %v4749_v31, %v4758_v10 }
 0x3ef   :  { %v4808_v32 = vpop.f32.mrf.mxu0  ;;  %v4810_v27 = vpop.f32.mrf.mxu1 }
 0x3f0   :  { %v3142_v14 = vadd.f32 %v3141_v36, %v3127_v44 }
 0x3f1   :  { %v2337_v59 = vpop.f32.mrf.mxu2 }
 0x3f2   :  { %v2338_v63 = vadd.f32 %v2337_v59, %v4622_v18  ;;  %v2854_v60 = vpop.f32.mrf.mxu3  ;;  %2987 = vmatmul.f32.gmra.mxu0 %v4550_v15  ;;  %3073 = vmatmul.f32.gmra.mxu1 %v4566_v4 }
 0x3f4   :  { %v2420_v22 = vadd.f32 %v2419_v47, %v2338_v63 }
 0x3f6   :  { %v3128_v51 = vmul.f32 %v2420_v22, %v2420_v22 }
 0x3f7   :  { %v4815_v34 = vpop.f32.mrf.mxu0  ;;  %v4817_v50 = vpop.f32.mrf.mxu1 }
 0x3f8   :  { %v3143_v11 = vadd.f32 %v3142_v14, %v3128_v51 }
 0x3f9   :  { %v2755_v20 = vpop.f32.mrf.mxu2 }
 0x3fa   :  { %v2756_v26 = vadd.f32 %v2755_v20, %v2672_v58  ;;  %2991 = vmatmul.f32.gmra.mxu0 %v4566_v4  ;;  %3077 = vmatmul.f32.gmra.mxu1 %v4583_v30  ;;  %v2860_v15 = vpop.f32.mrf.mxu3 }
 0x3fb   :  { %3144 = vadd.xlane.f32.xlu2 %v3143_v11 }
 0x3fc   :  { %v4823_v18 = vadd.f32 %v2854_v60, %v2756_v26 }
 0x3ff   :  { %v4825_v42 = vpop.f32.mrf.mxu0  ;;  %v2703_v33 = vpop.f32.mrf.mxu1 }
 0x401   :  { %v2760_v48 = vpop.f32.mrf.mxu2 }
 0x402   :  { %v2761_v17 = vadd.f32 %v2760_v48, %v2676_v1  ;;  %2995 = vmatmul.f32.gmra.mxu0 %v4583_v30  ;;  %3081 = vmatmul.f32.gmra.mxu1 %v4600_v28  ;;  %v2866_v4 = vpop.f32.mrf.mxu3 }
 0x404   :  { %v2861_v31 = vadd.f32 %v2860_v15, %v2761_v17 }
 0x407   :  { %v2589_v10 = vpop.f32.mrf.mxu0  ;;  %v2707_v57 = vpop.f32.mrf.mxu1 }
 0x408   :  { %v4833_v13 = vadd.f32 %v2703_v33, %v2589_v10 }
 0x409   :  { %v2765_v3 = vpop.f32.mrf.mxu2 }
 0x40a   :  { %v2766_v5 = vadd.f32 %v2765_v3, %v2680_v56  ;;  %2999 = vmatmul.f32.gmra.mxu0 %v4600_v28  ;;  %3085 = vmatmul.f32.gmra.mxu1 %v4619_v0  ;;  %v2872_v6 = vpop.f32.mrf.mxu3 }
 0x40c   :  { %v2867_v49 = vadd.f32 %v2866_v4, %v2766_v5 }
 0x40f   :  { %v2597_v43 = vpop.f32.mrf.mxu0  ;;  %v2711_v30 = vpop.f32.mrf.mxu1 }
 0x410   :  { %v4839_v12 = vadd.f32 %v2707_v57, %v2597_v43 }
 0x411   :  { %v2770_v9 = vpop.f32.mrf.mxu2 }
 0x412   :  { %v2771_v8 = vadd.f32 %v2770_v9, %v2684_v52  ;;  %3003 = vmatmul.f32.gmra.mxu0 %v4619_v0  ;;  %3089 = vmatmul.f32.gmra.mxu1 %v4639_v25  ;;  %v2878_v24 = vpop.f32.mrf.mxu3 }
 0x414   :  { %v2873_v61 = vadd.f32 %v2872_v6, %v2771_v8 }
 0x417   :  { %v2605_v55 = vpop.f32.mrf.mxu0  ;;  %v2715_v28 = vpop.f32.mrf.mxu1 }
 0x418   :  { %v4844_v19 = vadd.f32 %v2711_v30, %v2605_v55  ;;  %v3156_v30 = vpop.xlane.xlu1 %3155 }
 0x419   :  { %v2775_v29 = vpop.f32.mrf.mxu2  ;;  %v3157_v52 = vrot.slane %v3156_v30, 4 }
 0x41a   :  { %v2776_v53 = vadd.f32 %v2775_v29, %v2688_v62  ;;  %3007 = vmatmul.f32.gmra.mxu0 %v4639_v25  ;;  %3093 = vmatmul.f32.gmra.mxu1 %v4656_v41  ;;  %v2884_v48 = vpop.f32.mrf.mxu3 }
 0x41b   :  { %v3158_v62 = vadd.f32 %v3157_v52, %v3156_v30 }
 0x41c   :  { %v2879_v35 = vadd.f32 %v2878_v24, %v2776_v53 }
 0x41f   :  { %v2613_v37 = vpop.f32.mrf.mxu0  ;;  %v2719_v23 = vpop.f32.mrf.mxu1 }
 0x420   :  { %v4848_v0 = vadd.f32 %v2715_v28, %v2613_v37  ;;  %v2692_v28 = vadd.f32 %v4802_v45, %v4808_v32 }
 0x421   :  { %v2780_v11 = vpop.f32.mrf.mxu2 }
 0x422   :  { %3011 = vmatmul.f32.gmra.mxu0 %v4656_v41  ;;  %3097 = vmatmul.f32.gmra.mxu1 %v4675_v21  ;;  %v2890_v5 = vpop.f32.mrf.mxu3  ;;  %v2781_v29 = vadd.f32 %v2780_v11, %v2692_v28 }
 0x427   :  { %v2621_v36 = vpop.f32.mrf.mxu0  ;;  %v2723_v46 = vpop.f32.mrf.mxu1 }
 0x428   :  { %v4852_v7 = vadd.f32 %v2719_v23, %v2621_v36  ;;  %v3159_v23 = vrot.slane %v3158_v62, 2 }
 0x429   :  { %v2785_v10 = vpop.f32.mrf.mxu2 }
 0x42a   :  { %3015 = vmatmul.f32.gmra.mxu0 %v4675_v21  ;;  %3101 = vmatmul.f32.gmra.mxu1 %v4696_v39  ;;  %v2896_v24 = vpop.f32.mrf.mxu3 }
 0x42f   :  { %v2629_v25 = vpop.f32.mrf.mxu0  ;;  %v2727_v16 = vpop.f32.mrf.mxu1 }
 0x430   :  { %v4856_v40 = vadd.f32 %v2723_v46, %v2629_v25  ;;  %v2885_v46 = vadd.f32 %v2884_v48, %v2781_v29 }
 0x431   :  { %v2790_v6 = vpop.f32.mrf.mxu2 }
 0x432   :  { %3019 = vmatmul.f32.gmra.mxu0 %v4696_v39  ;;  %3105 = vmatmul.f32.gmra.mxu1 %v4717_v2 }
 0x437   :  { %v2637_v47 = vpop.f32.mrf.mxu0  ;;  %v2731_v41 = vpop.f32.mrf.mxu1 }
 0x438   :  { %v4860_v54 = vadd.f32 %v2727_v16, %v2637_v47 }
 0x43a   :  { %3023 = vmatmul.f32.gmra.mxu0 %v4717_v2  ;;  %3109 = vmatmul.f32.gmra.mxu1 %v4736_v38 }
 0x43f   :  { %v2645_v44 = vpop.f32.mrf.mxu0  ;;  %v3050_v21 = vpop.f32.mrf.mxu1 }
 0x440   :  { %v4864_v14 = vadd.f32 %v2731_v41, %v2645_v44  ;;  %v2696_v41 = vadd.f32 %v4810_v27, %v4815_v34  ;;  %v2795_v44 = vpop.f32.mrf.mxu2 }
 0x442   :  { %3027 = vmatmul.f32.gmra.mxu0 %v4736_v38  ;;  %v2786_v45 = vadd.f32 %v2785_v10, %v2696_v41 }
 0x447   :  { %v2968_v59 = vpop.f32.mrf.mxu0  ;;  %v3054_v63 = vpop.f32.mrf.mxu1 }
 0x448   :  { %v2969_v39 = vadd.f32 %v2968_v59, %v4823_v18 }
 0x44a   :  { %v3051_v60 = vadd.f32 %v3050_v21, %v2969_v39 }
 0x44c   :  { %v3165_v26 = vmul.f32 %v3051_v60, %v3051_v60 }
 0x44f   :  { %v2972_v22 = vpop.f32.mrf.mxu0  ;;  %v3058_v51 = vpop.f32.mrf.mxu1 }
 0x450   :  { %v2973_v58 = vadd.f32 %v2972_v22, %v2861_v31  ;;  %v2902_v22 = vpop.f32.mrf.mxu3 }
 0x452   :  { %v3055_v20 = vadd.f32 %v3054_v63, %v2973_v58  ;;  %v2891_v58 = vadd.f32 %v2890_v5, %v2786_v45  ;;  %v2796_v5 = vadd.f32 %v2795_v44, %v4833_v13 }
 0x454   :  { %v3166_v2 = vmul.f32 %v3055_v20, %v3055_v20 }
 0x456   :  { %v3181_v15 = vadd.f32 %v3166_v2, %v3165_v26 }
 0x457   :  { %v2976_v33 = vpop.f32.mrf.mxu0  ;;  %v3062_v1 = vpop.f32.mrf.mxu1 }
 0x458   :  { %v2977_v17 = vadd.f32 %v2976_v33, %v2867_v49 }
 0x45a   :  { %v3059_v4 = vadd.f32 %v3058_v51, %v2977_v17 }
 0x45c   :  { %v3167_v38 = vmul.f32 %v3059_v4, %v3059_v4 }
 0x45e   :  { %v3182_v57 = vadd.f32 %v3181_v15, %v3167_v38  ;;  %v2700_v15 = vadd.f32 %v4817_v50, %v4825_v42 }
 0x45f   :  { %v2980_v56 = vpop.f32.mrf.mxu0  ;;  %v3066_v3 = vpop.f32.mrf.mxu1 }
 0x460   :  { %v2981_v18 = vadd.f32 %v2980_v56, %v2873_v61  ;;  %v2791_v33 = vadd.f32 %v2790_v6, %v2700_v15 }
 0x462   :  { %v3063_v43 = vadd.f32 %v3062_v1, %v2981_v18  ;;  %v2800_v1 = vpop.f32.mrf.mxu2  ;;  %v2897_v38 = vadd.f32 %v2896_v24, %v2791_v33  ;;  %v2908_v18 = vpop.f32.mrf.mxu3 }
 0x464   :  { %v3168_v31 = vmul.f32 %v3063_v43, %v3063_v43 }
 0x466   :  { %v3183_v9 = vadd.f32 %v3182_v57, %v3168_v31  ;;  %v2903_v31 = vadd.f32 %v2902_v22, %v2796_v5 }
 0x467   :  { %v2984_v8 = vpop.f32.mrf.mxu0  ;;  %v3070_v55 = vpop.f32.mrf.mxu1 }
 0x468   :  { %v2985_v49 = vadd.f32 %v2984_v8, %v2879_v35  ;;  %v3160_v35 = vadd.f32 %v3159_v23, %v3158_v62  ;;  %v2801_v8 = vadd.f32 %v2800_v1, %v4839_v12 }
 0x46a   :  { %v3067_v53 = vadd.f32 %v3066_v3, %v2985_v49  ;;  %v3161_v11 = vrot.slane %v3160_v35, 1  ;;  %v2805_v30 = vpop.f32.mrf.mxu2  ;;  %v2914_v28 = vpop.f32.mrf.mxu3 }
 0x46b   :  { %v2806_v13 = vadd.f32 %v2805_v30, %v4844_v19 }
 0x46c   :  { %v3169_v37 = vmul.f32 %v3067_v53, %v3067_v53  ;;  %v3162_v17 = vadd.f32 %v3161_v11, %v3160_v35  ;;  %v2909_v53 = vadd.f32 %v2908_v18, %v2801_v8 }
 0x46e   :  { %v3184_v61 = vadd.f32 %v3183_v9, %v3169_v37  ;;  %v3145_v36 = vpop.xlane.xlu2 %3144 }
 0x46f   :  { %v3146_v25 = vrot.slane %v3145_v36, 4  ;;  %v2988_v16 = vpop.f32.mrf.mxu0  ;;  %v3074_v47 = vpop.f32.mrf.mxu1 }
 0x470   :  { %v2989_v21 = vadd.f32 %v2988_v16, %v2885_v46  ;;  %v2915_v16 = vadd.f32 %v2914_v28, %v2806_v13 }
 0x471   :  { %v3147_v59 = vadd.f32 %v3146_v25, %v3145_v36 }
 0x472   :  { %v3071_v32 = vadd.f32 %v3070_v55, %v2989_v21  ;;  %v2810_v62 = vpop.f32.mrf.mxu2  ;;  %v2920_v46 = vpop.f32.mrf.mxu3 }
 0x473   :  { %v3148_v63 = vrot.slane %v3147_v59, 2  ;;  %v2811_v21 = vadd.f32 %v2810_v62, %v4848_v0 }
 0x474   :  { %v3170_v39 = vmul.f32 %v3071_v32, %v3071_v32 }
 0x475   :  { %v3149_v60 = vadd.f32 %v3148_v63, %v3147_v59  ;;  %v2921_v35 = vadd.f32 %v2920_v46, %v2811_v21 }
 0x476   :  { %v3185_v51 = vadd.f32 %v3184_v61, %v3170_v39 }
 0x477   :  { %v2992_v20 = vpop.f32.mrf.mxu0  ;;  %v3078_v26 = vpop.f32.mrf.mxu1  ;;  %v3150_v2 = vrot.slane %v3149_v60, 1 }
 0x478   :  { %v2993_v27 = vadd.f32 %v2992_v20, %v2891_v58 }
 0x479   :  { %v3151_v34 = vadd.f32 %v3150_v2, %v3149_v60 }
 0x47a   :  { %v3075_v48 = vadd.f32 %v3074_v47, %v2993_v27  ;;  %v2815_v41 = vpop.f32.mrf.mxu2  ;;  %v2926_v63 = vpop.f32.mrf.mxu3 }
 0x47b   :  { %3983 = vpush %v3151_v34  ;;  %v2816_v19 = vadd.f32 %v2815_v41, %v4852_v7 }
 0x47c   :  { %v3171_v4 = vmul.f32 %v3075_v48, %v3075_v48  ;;  %3985 = vpush %v3162_v17 }
 0x47e   :  { %v3186_v10 = vadd.f32 %v3185_v51, %v3171_v4 }
 0x47f   :  { %v2996_v57 = vpop.f32.mrf.mxu0  ;;  %v3082_v56 = vpop.f32.mrf.mxu1 }
 0x480   :  { %v2997_v3 = vadd.f32 %v2996_v57, %v2897_v38 }
 0x482   :  { %v3079_v43 = vadd.f32 %v3078_v26, %v2997_v3  ;;  %v2820_v22 = vpop.f32.mrf.mxu2  ;;  %v2927_v26 = vadd.f32 %v2926_v63, %v2816_v19  ;;  %v2932_v27 = vpop.f32.mrf.mxu3 }
 0x483   :  { %v2821_v0 = vadd.f32 %v2820_v22, %v4856_v40 }
 0x484   :  { %v3172_v50 = vmul.f32 %v3079_v43, %v3079_v43 }
 0x485   :  { %v2933_v4 = vadd.f32 %v2932_v27, %v2821_v0 }
 0x486   :  { %v3187_v42 = vadd.f32 %v3186_v10, %v3172_v50 }
 0x487   :  { %v3000_v52 = vpop.f32.mrf.mxu0  ;;  %v3086_v6 = vpop.f32.mrf.mxu1 }
 0x488   :  { %v3001_v9 = vadd.f32 %v3000_v52, %v2903_v31 }
 0x48a   :  { %v3083_v55 = vadd.f32 %v3082_v56, %v3001_v9  ;;  %v2825_v33 = vpop.f32.mrf.mxu2  ;;  %v2938_v56 = vpop.f32.mrf.mxu3 }
 0x48b   :  { %v2826_v7 = vadd.f32 %v2825_v33, %v4860_v54 }
 0x48c   :  { %v3173_v49 = vmul.f32 %v3083_v55, %v3083_v55 }
 0x48d   :  { %v2939_v43 = vadd.f32 %v2938_v56, %v2826_v7 }
 0x48e   :  { %v3188_v29 = vadd.f32 %v3187_v42, %v3173_v49 }
 0x48f   :  { %v3004_v24 = vpop.f32.mrf.mxu0  ;;  %v3090_v37 = vpop.f32.mrf.mxu1 }
 0x490   :  { %v3005_v23 = vadd.f32 %v3004_v24, %v2909_v53  ;;  %v4177_v53 = vmov 6272.0   ;;  %v3209_v24 = vpop.xlane.xlu1 %3208 }
 0x491   :  { %4023 = vrcp.f32 %v4177_v53 }
 0x492   :  { %v3087_v61 = vadd.f32 %v3086_v6, %v3005_v23  ;;  %v2830_v18 = vpop.f32.mrf.mxu2  ;;  %v2944_v6 = vpop.f32.mrf.mxu3 }
 0x493   :  { %v2831_v40 = vadd.f32 %v2830_v18, %v4864_v14 }
 0x494   :  { %v3174_v36 = vmul.f32 %v3087_v61, %v3087_v61 }
 0x495   :  { %v2945_v9 = vadd.f32 %v2944_v6, %v2831_v40 }
 0x496   :  { %v3189_v25 = vadd.f32 %v3188_v29, %v3174_v36 }
 0x497   :  { %v3008_v47 = vpop.f32.mrf.mxu0  ;;  %v3094_v12 = vpop.f32.mrf.mxu1 }
 0x498   :  { %v3009_v44 = vadd.f32 %v3008_v47, %v2915_v16  ;;  %v4024_v23 = vpop.eup %4023 }
 0x499   :  { %v3219_v61 = vmul.f32 6272.0, %v4024_v23  ;;  %vm3223_vm0 = vweird.f32 %v4024_v23 }
 0x49a   :  { %v3091_v59 = vadd.f32 %v3090_v37, %v3009_v44  ;;  %v3210_v37 = vrot.slane %v3209_v24, 4 }
 0x49b   :  { %v3220_v46 = vsub.f32 1.0, %v3219_v61 }
 0x49c   :  { %v3175_v45 = vmul.f32 %v3091_v59, %v3091_v59  ;;  %v3211_v13 = vadd.f32 %v3210_v37, %v3209_v24 }
 0x49d   :  { %v3221_v41 = vmul.f32 %v4024_v23, %v3220_v46 }
 0x49e   :  { %v3190_v32 = vadd.f32 %v3189_v25, %v3175_v45  ;;  %v3212_v14 = vrot.slane %v3211_v13, 2 }
 0x49f   :  { %v3012_v39 = vpop.f32.mrf.mxu0  ;;  %v3098_v58 = vpop.f32.mrf.mxu1  ;;  %v3222_v59 = vadd.f32 %v4024_v23, %v3221_v41 }
 0x4a0   :  { %v3013_v60 = vadd.f32 %v3012_v39, %v2921_v35  ;;  %v3213_v47 = vadd.f32 %v3212_v14, %v3211_v13 }
 0x4a1   :  { %v3224_v63 = vsel %vm3223_vm0, %v4024_v23, %v3222_v59 }
 0x4a2   :  { %v3095_v51 = vadd.f32 %v3094_v12, %v3013_v60  ;;  %v3214_v21 = vrot.slane %v3213_v47, 1 }
 0x4a4   :  { %v3176_v11 = vmul.f32 %v3095_v51, %v3095_v51  ;;  %v3215_v35 = vadd.f32 %v3214_v21, %v3213_v47 }
 0x4a6   :  { %v3191_v20 = vadd.f32 %v3190_v32, %v3176_v11 }
 0x4a7   :  { %v3016_v2 = vpop.f32.mrf.mxu0  ;;  %v3102_v48 = vpop.f32.mrf.mxu1 }
 0x4a8   :  { %v3017_v15 = vadd.f32 %v3016_v2, %v2927_v26 }
 0x4aa   :  { %v3099_v34 = vadd.f32 %v3098_v58, %v3017_v15 }
 0x4ac   :  { %v3177_v1 = vmul.f32 %v3099_v34, %v3099_v34  ;;  %s3984_s22 = spop %3983 }
 0x4ad   :  { %s3986_s24 = spop %3985 }
 0x4ae   :  { %v3192_v17 = vadd.f32 %v3191_v20, %v3177_v1  ;;  %s3164_s26 = ssub.f32 %s3984_s22, %s3986_s24 }
 0x4af   :  { %v3020_v10 = vpop.f32.mrf.mxu0  ;;  %v3106_v30 = vpop.f32.mrf.mxu1 }
 0x4b0   :  { %v3021_v38 = vadd.f32 %v3020_v10, %v2933_v4 }
 0x4b2   :  { %v3103_v57 = vadd.f32 %v3102_v48, %v3021_v38 }
 0x4b4   :  { %v3178_v3 = vmul.f32 %v3103_v57, %v3103_v57 }
 0x4b6   :  { %v3193_v5 = vadd.f32 %v3192_v17, %v3178_v3 }
 0x4b7   :  { %v3024_v50 = vpop.f32.mrf.mxu0  ;;  %v3110_v49 = vpop.f32.mrf.mxu1 }
 0x4b8   :  { %v3025_v42 = vadd.f32 %v3024_v50, %v2939_v43 }
 0x4ba   :  { %v3107_v31 = vadd.f32 %v3106_v30, %v3025_v42 }
 0x4bc   :  { %v3179_v52 = vmul.f32 %v3107_v31, %v3107_v31 }
 0x4be   :  { %v3194_v8 = vadd.f32 %v3193_v5, %v3179_v52 }
 0x4bf   :  { %v3028_v55 = vpop.f32.mrf.mxu0 }
 0x4c0   :  { %v3029_v28 = vadd.f32 %v3028_v55, %v2945_v9 }
 0x4c2   :  { %v3111_v54 = vadd.f32 %v3110_v49, %v3029_v28 }
 0x4c4   :  { %v3180_v62 = vmul.f32 %v3111_v54, %v3111_v54 }
 0x4c6   :  { %v3195_v29 = vadd.f32 %v3194_v8, %v3180_v62 }
 0x4c8   :  { %3196 = vadd.xlane.f32.xlu2 %v3195_v29 }
 0x53b   :  { %v3197_v36 = vpop.xlane.xlu2 %3196 }
 0x53c   :  { %v3198_v25 = vrot.slane %v3197_v36, 4 }
 0x53e   :  { %v3199_v16 = vadd.f32 %v3198_v25, %v3197_v36 }
 0x540   :  { %v3200_v44 = vrot.slane %v3199_v16, 2 }
 0x542   :  { %v3201_v12 = vadd.f32 %v3200_v44, %v3199_v16 }
 0x544   :  { %v3202_v45 = vrot.slane %v3201_v12, 1 }
 0x546   :  { %v3203_v32 = vadd.f32 %v3202_v45, %v3201_v12 }
 0x548   :  { %3987 = vpush %v3203_v32 }
 0x549   :  { %3989 = vpush %v3215_v35 }
 0x54a   :  { %3991 = vpush %v3224_v63 }
 0x579   :  { %s3988_s28 = spop %3987 }
 0x57a   :  { %s3205_s29 = sadd.f32 %s3988_s28, %s3164_s26  ;;  %s3990_s30 = spop %3989 }
 0x57b   :  { %s3992_s1 = spop %3991 }
 0x57c   :  { %s3217_s7 = ssub.f32 %s3205_s29, %s3990_s30 }
 0x57e   :  { %s3226_s11 = smul.f32 %s3992_s1, %s3217_s7 }
 0x580   :  { %s3230_s12 = sadd.f32 %s3229_s3, %s3226_s11 }
 0x582   :  { %3232 = sst [smem:[#allocation11]] %s3230_s12 }
 0x583   :  { %3241 = dma.smem_to_hbm %s4178_s13, 16, %s3239_s10, [#allocation4]  }
 0x584   :  { %4164 = dma.done.wait [#allocation4], 16  }
 0x585   :  { %4165 = vsyncadd [#allocation4], 4294967280 }
 0x586   :  { %3246 = sfence }
 0x587   :  { %3247 = vsyncpa [#allocation3], 1 }
 0x588   :  { %3248 = vsyncpa [#allocation6], 1 }
 0x589   :  { %3249 = vsyncpa [#allocation9], 1 }
 0x58a   :  { %3250 = vsyncpa [#allocation4], 1 }

</bundles_post_ra>
